<compile_context>
chip_gen: v6e
topology: v6e:2x2x1
jax: 0.10.0
libtpu: 0.0.40
codegen_flags: <defaults>
</compile_context>

<pallas_src>
import functools
import math

import jax
import jax.numpy as jnp
from jax.experimental import pallas as pl

FEATURE_DIM = 64                                          # GRU hidden size
IN_DIM = 370                                              # raw feature size
MID_DIM = math.ceil(math.sqrt(IN_DIM * FEATURE_DIM))      # 154
FC_IN = FEATURE_DIM + IN_DIM                              # 434
IN_PAD = 384                                              # 370 padded to lane-tile multiple
GATE_PITCH = 128                                          # each gate padded to one lane tile
GATES_PAD = 3 * GATE_PITCH                                # 384


# ---------------------------------------------------------------------------
# Fused Pallas kernel: AutoEncoder + GRU + FC head, everything VMEM-resident.
# ---------------------------------------------------------------------------
def _fused_gru_kernel(
    x_ref, latest_ref,
    enc_w1_ref, enc_b1_ref, enc_w2_ref, enc_b2_ref,
    dec_w1_ref, dec_b1_ref, dec_w2_ref, dec_b2_ref,
    gru_wi_ref, gru_bi_ref, gru_wh_ref, gru_bhn_ref,
    fc_w1h_ref, fc_w1l_ref, fc_b1_ref,
    fc_w2_ref, fc_b2_ref, fc_w3_ref, fc_b3_ref,
    decode_ref, pref_ref,
    *, batch, seq,
):
    H = FEATURE_DIM
    G = GATE_PITCH
    f32 = jnp.float32
    bf16 = jnp.bfloat16

    # ---- AutoEncoder (rows are time-major: (T*B, 370)) ----
    x_bf = x_ref[...].astype(bf16)
    h1 = jnp.tanh(jnp.dot(x_bf, enc_w1_ref[...],
                          preferred_element_type=f32) + enc_b1_ref[...])
    enc = (jnp.dot(h1.astype(bf16), enc_w2_ref[...],
                   preferred_element_type=f32) + enc_b2_ref[...])            # (T*B, 64)
    enc_bf = enc.astype(bf16)
    d1 = jnp.tanh(jnp.dot(enc_bf, dec_w1_ref[...],
                          preferred_element_type=f32) + dec_b1_ref[...])
    decode_ref[...] = (jnp.dot(d1.astype(bf16), dec_w2_ref[...],
                               preferred_element_type=f32)
                       + dec_b2_ref[...]).astype(decode_ref.dtype)           # (T*B, 384)

    # ---- GRU input projections: one packed, lane-aligned (64, 384) matmul.
    #      Packed bias holds (b_ir+b_hr | b_iz+b_hz | b_in) at lanes 0/128/256. ----
    xg = (jnp.dot(enc_bf, gru_wi_ref[...],
                  preferred_element_type=f32) + gru_bi_ref[...])             # (T*B, 384)

    wh = gru_wh_ref[...]                                                     # (64, 384) bf16
    bhn = jnp.broadcast_to(gru_bhn_ref[...], (batch, H))                     # hoisted, f32

    # ---- GRU recurrence, h0 = 0, fully unrolled over T (static).  State in f32. ----
    h = jnp.zeros((batch, H), f32)
    for t in range(seq):
        xg_t = xg[t * batch:(t + 1) * batch, :]                              # contiguous rows
        hg = jnp.dot(h.astype(bf16), wh, preferred_element_type=f32)         # (B, 384)
        r = jax.nn.sigmoid(xg_t[:, 0:H] + hg[:, 0:H])
        z = jax.nn.sigmoid(xg_t[:, G:G + H] + hg[:, G:G + H])
        n = jnp.tanh(xg_t[:, 2 * G:2 * G + H] + r * (hg[:, 2 * G:2 * G + H] + bhn))
        h = (1.0 - z) * n + z * h                                            # (B, 64)

    # ---- FC head: concat(hidden, latest) expressed as two split matmuls. ----
    f1 = (jnp.dot(h.astype(bf16), fc_w1h_ref[...], preferred_element_type=f32)
          + jnp.dot(latest_ref[...].astype(bf16), fc_w1l_ref[...],
                    preferred_element_type=f32)
          + fc_b1_ref[...])                                                  # (B, 128)
    f2 = jnp.maximum(jnp.dot(f1.astype(bf16), fc_w2_ref[...],
                             preferred_element_type=f32) + fc_b2_ref[...], 0.0)
    pref_ref[...] = (jnp.dot(f2.astype(bf16), fc_w3_ref[...],
                             preferred_element_type=f32)
                     + fc_b3_ref[...]).astype(pref_ref.dtype)                # (B, 2)


def _full_spec(a):
    return pl.BlockSpec(a.shape, lambda: (0,) * a.ndim)


def fused_forward(packed, x_tm, latest, batch, seq):
    M = batch * seq
    inputs = (
        x_tm, latest,
        packed["enc_w1"], packed["enc_b1"], packed["enc_w2"], packed["enc_b2"],
        packed["dec_w1"], packed["dec_b1"], packed["dec_w2"], packed["dec_b2"],
        packed["gru_wi"], packed["gru_bi"], packed["gru_wh"], packed["gru_bhn"],
        packed["fc_w1h"], packed["fc_w1l"], packed["fc_b1"],
        packed["fc_w2"], packed["fc_b2"], packed["fc_w3"], packed["fc_b3"],
    )
    decode_pad, pref = pl.pallas_call(
        functools.partial(_fused_gru_kernel, batch=batch, seq=seq),
        out_shape=(
            jax.ShapeDtypeStruct((M, IN_PAD), jnp.float32),
            jax.ShapeDtypeStruct((batch, 2), jnp.float32),
        ),
        in_specs=[_full_spec(a) for a in inputs],
        out_specs=(
            pl.BlockSpec((M, IN_PAD), lambda: (0, 0)),
            pl.BlockSpec((batch, 2), lambda: (0, 0)),
        ),
    )(*inputs)
    return decode_pad, pref


# ---------------------------------------------------------------------------
# Parameter construction (deterministic, synthetic, PyTorch-structured) +
# one-time packing into the kernel-friendly bf16 / lane-aligned layout.
# ---------------------------------------------------------------------------
def _uniform(key, shape, fan_in):
    bound = 1.0 / math.sqrt(fan_in)
    return jax.random.uniform(key, shape, jnp.float32, minval=-bound, maxval=bound)


def init_params(key):
    ks = iter(jax.random.split(key, 40))
    p = {}
    # AutoEncoder: weights stored as (in, out) so forward is x @ W + b
    p["enc_w1"] = _uniform(next(ks), (IN_DIM, MID_DIM), IN_DIM)
    p["enc_b1"] = _uniform(next(ks), (MID_DIM,), IN_DIM)
    p["enc_w2"] = _uniform(next(ks), (MID_DIM, FEATURE_DIM), MID_DIM)
    p["enc_b2"] = _uniform(next(ks), (FEATURE_DIM,), MID_DIM)
    p["dec_w1"] = _uniform(next(ks), (FEATURE_DIM, MID_DIM), FEATURE_DIM)
    p["dec_b1"] = _uniform(next(ks), (MID_DIM,), FEATURE_DIM)
    p["dec_w2"] = _uniform(next(ks), (MID_DIM, IN_DIM), MID_DIM)
    p["dec_b2"] = _uniform(next(ks), (IN_DIM,), MID_DIM)
    # GRU (input_size = hidden_size = FEATURE_DIM), gates r, z, n
    H = FEATURE_DIM
    for g in ("r", "z", "n"):
        p[f"gru_wi{g}"] = _uniform(next(ks), (H, H), H)   # (in, out) for x @ W
        p[f"gru_wh{g}"] = _uniform(next(ks), (H, H), H)   # (in, out) for h @ W
        p[f"gru_bi{g}"] = _uniform(next(ks), (H,), H)
        p[f"gru_bh{g}"] = _uniform(next(ks), (H,), H)
    # fc1: Linear(434,128) -> Linear(128,32) -> ReLU -> Linear(32,2)
    p["fc_w1"] = _uniform(next(ks), (FC_IN, 2 * H), FC_IN)
    p["fc_b1"] = _uniform(next(ks), (2 * H,), FC_IN)
    p["fc_w2"] = _uniform(next(ks), (2 * H, 32), 2 * H)
    p["fc_b2"] = _uniform(next(ks), (32,), 2 * H)
    p["fc_w3"] = _uniform(next(ks), (32, 2), 32)
    p["fc_b3"] = _uniform(next(ks), (2,), 32)
    return p


def pack_params(p):
    """One-time repack of PyTorch-structured params into the fused-kernel layout.

    - Weight matrices -> bfloat16 (biases stay float32).
    - GRU gates r/z/n placed at lane offsets 0/128/256 (zero-padded to 384).
    - b_hr / b_hz folded into the input-projection bias (exact); b_hn kept separate.
    - fc_w1 split so concat(hidden, latest) becomes two matmuls.
    - dec_w2 / dec_b2 padded to 384 output lanes for lane-dense stores.
    """
    H = FEATURE_DIM
    G = GATE_PITCH
    bf16 = jnp.bfloat16

    def gate_pack(wr, wz, wn):
        rows = wr.shape[0]
        out = jnp.zeros((rows, GATES_PAD), jnp.float32)
        out = out.at[:, 0:H].set(wr)
        out = out.at[:, G:G + H].set(wz)
        out = out.at[:, 2 * G:2 * G + H].set(wn)
        return out

    gru_wi = gate_pack(p["gru_wir"], p["gru_wiz"], p["gru_win"])
    gru_wh = gate_pack(p["gru_whr"], p["gru_whz"], p["gru_whn"])
    gru_bi = gate_pack((p["gru_bir"] + p["gru_bhr"]).reshape(1, H),
                       (p["gru_biz"] + p["gru_bhz"]).reshape(1, H),
                       p["gru_bin"].reshape(1, H))

    dec_w2 = jnp.pad(p["dec_w2"], ((0, 0), (0, IN_PAD - IN_DIM)))
    dec_b2 = jnp.pad(p["dec_b2"].reshape(1, IN_DIM), ((0, 0), (0, IN_PAD - IN_DIM)))

    packed = {
        "enc_w1": p["enc_w1"].astype(bf16), "enc_b1": p["enc_b1"].reshape(1, MID_DIM),
        "enc_w2": p["enc_w2"].astype(bf16), "enc_b2": p["enc_b2"].reshape(1, H),
        "dec_w1": p["dec_w1"].astype(bf16), "dec_b1": p["dec_b1"].reshape(1, MID_DIM),
        "dec_w2": dec_w2.astype(bf16),      "dec_b2": dec_b2,
        "gru_wi": gru_wi.astype(bf16),      "gru_bi": gru_bi,
        "gru_wh": gru_wh.astype(bf16),      "gru_bhn": p["gru_bhn"].reshape(1, H),
        "fc_w1h": p["fc_w1"][:H, :].astype(bf16),     # (64, 128)
        "fc_w1l": p["fc_w1"][H:, :].astype(bf16),     # (370, 128)
        "fc_b1": p["fc_b1"].reshape(1, 2 * H),
        "fc_w2": p["fc_w2"].astype(bf16), "fc_b2": p["fc_b2"].reshape(1, 32),
        "fc_w3": p["fc_w3"].astype(bf16), "fc_b3": p["fc_b3"].reshape(1, 2),
    }
    return packed


# ---------------------------------------------------------------------------
# Forward pass: one fused Pallas call; layout plumbing lives in the wrapper.
# ---------------------------------------------------------------------------
@functools.partial(jax.jit, static_argnames=("batch", "seq"))
def gru_model_forward(packed, source_feature_list1, latest_source_feature, *, batch, seq):
    # Time-major flatten so every recurrence step reads contiguous rows in-kernel.
    x_tm = jnp.transpose(source_feature_list1, (1, 0, 2)).reshape(batch * seq, IN_DIM)
    decode_pad, pref1 = fused_forward(packed, x_tm, latest_source_feature, batch, seq)
    # Un-pad lanes (384 -> 370) and restore batch-major (B, T, 370).
    decode_s = decode_pad[:, :IN_DIM].reshape(seq, batch, IN_DIM).transpose(1, 0, 2)
    return decode_s, pref1


if __name__ == "__main__":
    key = jax.random.PRNGKey(0)
    k_param, k_x, k_latest = jax.random.split(key, 3)

    B, T = 2, 8
    params = init_params(k_param)
    packed = pack_params(params)
    source_feature_list1 = jax.random.normal(k_x, (B, T, IN_DIM), jnp.float32)
    latest_source_feature = jax.random.normal(k_latest, (B, IN_DIM), jnp.float32)

    decode_s, pref1 = gru_model_forward(
        packed, source_feature_list1, latest_source_feature, batch=B, seq=T)
    jax.block_until_ready((decode_s, pref1))

    assert decode_s.shape == (B, T, IN_DIM)
    assert pref1.shape == (B, 2)
    assert bool(jnp.all(jnp.isfinite(decode_s)))
    assert bool(jnp.all(jnp.isfinite(pref1)))
    print("KERNEL_OK")
</pallas_src>

<mosaic_0001>
module attributes {stable_mosaic.version = 11 : i64} {
  func.func @_fused_gru_kernel(%arg0: memref<16x370xf32, #tpu.memory_space<vmem>>, %arg1: memref<2x370xf32, #tpu.memory_space<vmem>>, %arg2: memref<370x154xbf16, #tpu.memory_space<vmem>>, %arg3: memref<1x154xf32, #tpu.memory_space<vmem>>, %arg4: memref<154x64xbf16, #tpu.memory_space<vmem>>, %arg5: memref<1x64xf32, #tpu.memory_space<vmem>>, %arg6: memref<64x154xbf16, #tpu.memory_space<vmem>>, %arg7: memref<1x154xf32, #tpu.memory_space<vmem>>, %arg8: memref<154x384xbf16, #tpu.memory_space<vmem>>, %arg9: memref<1x384xf32, #tpu.memory_space<vmem>>, %arg10: memref<64x384xbf16, #tpu.memory_space<vmem>>, %arg11: memref<1x384xf32, #tpu.memory_space<vmem>>, %arg12: memref<64x384xbf16, #tpu.memory_space<vmem>>, %arg13: memref<1x64xf32, #tpu.memory_space<vmem>>, %arg14: memref<64x128xbf16, #tpu.memory_space<vmem>>, %arg15: memref<370x128xbf16, #tpu.memory_space<vmem>>, %arg16: memref<1x128xf32, #tpu.memory_space<vmem>>, %arg17: memref<128x32xbf16, #tpu.memory_space<vmem>>, %arg18: memref<1x32xf32, #tpu.memory_space<vmem>>, %arg19: memref<32x2xbf16, #tpu.memory_space<vmem>>, %arg20: memref<1x2xf32, #tpu.memory_space<vmem>>, %arg21: memref<16x384xf32, #tpu.memory_space<vmem>>, %arg22: memref<2x2xf32, #tpu.memory_space<vmem>>) attributes {dimension_semantics = [], scalar_prefetch = 0 : i64, scratch_operands = 0 : i64, tpu.core_type = #tpu.core_type<tc>} {
    %c0 = arith.constant 0 : index
    %c0_0 = arith.constant 0 : index
    %0 = vector.load %arg0[%c0, %c0_0] : memref<16x370xf32, #tpu.memory_space<vmem>>, vector<16x370xf32>
    %1 = arith.truncf %0 : vector<16x370xf32> to vector<16x370xbf16>
    %c0_1 = arith.constant 0 : index
    %c0_2 = arith.constant 0 : index
    %2 = vector.load %arg2[%c0_1, %c0_2] : memref<370x154xbf16, #tpu.memory_space<vmem>>, vector<370x154xbf16>
    %cst = arith.constant dense<0.000000e+00> : vector<16x154xf32>
    %3 = tpu.matmul %1, %2, %cst {dimension_numbers = #tpu.dot_dimension_numbers<[1], [0], [0], [1], [0, 0, 1, 1], [], []>} : vector<16x370xbf16>, vector<370x154xbf16>, vector<16x154xf32> -> vector<16x154xf32>
    %c0_3 = arith.constant 0 : index
    %c0_4 = arith.constant 0 : index
    %4 = vector.load %arg3[%c0_3, %c0_4] : memref<1x154xf32, #tpu.memory_space<vmem>>, vector<1x154xf32>
    %5 = vector.broadcast %4 : vector<1x154xf32> to vector<16x154xf32>
    %6 = arith.addf %3, %5 : vector<16x154xf32>
    %7 = math.tanh %6 : vector<16x154xf32>
    %8 = arith.truncf %7 : vector<16x154xf32> to vector<16x154xbf16>
    %c0_5 = arith.constant 0 : index
    %c0_6 = arith.constant 0 : index
    %9 = vector.load %arg4[%c0_5, %c0_6] : memref<154x64xbf16, #tpu.memory_space<vmem>>, vector<154x64xbf16>
    %cst_7 = arith.constant dense<0.000000e+00> : vector<16x64xf32>
    %10 = tpu.matmul %8, %9, %cst_7 {dimension_numbers = #tpu.dot_dimension_numbers<[1], [0], [0], [1], [0, 0, 1, 1], [], []>} : vector<16x154xbf16>, vector<154x64xbf16>, vector<16x64xf32> -> vector<16x64xf32>
    %c0_8 = arith.constant 0 : index
    %c0_9 = arith.constant 0 : index
    %11 = vector.load %arg5[%c0_8, %c0_9] : memref<1x64xf32, #tpu.memory_space<vmem>>, vector<1x64xf32>
    %12 = vector.broadcast %11 : vector<1x64xf32> to vector<16x64xf32>
    %13 = arith.addf %10, %12 : vector<16x64xf32>
    %14 = arith.truncf %13 : vector<16x64xf32> to vector<16x64xbf16>
    %c0_10 = arith.constant 0 : index
    %c0_11 = arith.constant 0 : index
    %15 = vector.load %arg6[%c0_10, %c0_11] : memref<64x154xbf16, #tpu.memory_space<vmem>>, vector<64x154xbf16>
    %cst_12 = arith.constant dense<0.000000e+00> : vector<16x154xf32>
    %16 = tpu.matmul %14, %15, %cst_12 {dimension_numbers = #tpu.dot_dimension_numbers<[1], [0], [0], [1], [0, 0, 1, 1], [], []>} : vector<16x64xbf16>, vector<64x154xbf16>, vector<16x154xf32> -> vector<16x154xf32>
    %c0_13 = arith.constant 0 : index
    %c0_14 = arith.constant 0 : index
    %17 = vector.load %arg7[%c0_13, %c0_14] : memref<1x154xf32, #tpu.memory_space<vmem>>, vector<1x154xf32>
    %18 = vector.broadcast %17 : vector<1x154xf32> to vector<16x154xf32>
    %19 = arith.addf %16, %18 : vector<16x154xf32>
    %20 = math.tanh %19 : vector<16x154xf32>
    %21 = arith.truncf %20 : vector<16x154xf32> to vector<16x154xbf16>
    %c0_15 = arith.constant 0 : index
    %c0_16 = arith.constant 0 : index
    %22 = vector.load %arg8[%c0_15, %c0_16] : memref<154x384xbf16, #tpu.memory_space<vmem>>, vector<154x384xbf16>
    %cst_17 = arith.constant dense<0.000000e+00> : vector<16x384xf32>
    %23 = tpu.matmul %21, %22, %cst_17 {dimension_numbers = #tpu.dot_dimension_numbers<[1], [0], [0], [1], [0, 0, 1, 1], [], []>} : vector<16x154xbf16>, vector<154x384xbf16>, vector<16x384xf32> -> vector<16x384xf32>
    %c0_18 = arith.constant 0 : index
    %c0_19 = arith.constant 0 : index
    %24 = vector.load %arg9[%c0_18, %c0_19] : memref<1x384xf32, #tpu.memory_space<vmem>>, vector<1x384xf32>
    %25 = vector.broadcast %24 : vector<1x384xf32> to vector<16x384xf32>
    %26 = arith.addf %23, %25 : vector<16x384xf32>
    %c0_20 = arith.constant 0 : index
    %c0_21 = arith.constant 0 : index
    %27 = vector.load %arg21[%c0_20, %c0_21] : memref<16x384xf32, #tpu.memory_space<vmem>>, vector<16x384xf32>
    tpu.vector_store %arg21[%c0_20, %c0_21], %26 {strides = array<i32>} : memref<16x384xf32, #tpu.memory_space<vmem>>, vector<16x384xf32>,
    %c0_22 = arith.constant 0 : index
    %c0_23 = arith.constant 0 : index
    %28 = vector.load %arg10[%c0_22, %c0_23] : memref<64x384xbf16, #tpu.memory_space<vmem>>, vector<64x384xbf16>
    %cst_24 = arith.constant dense<0.000000e+00> : vector<16x384xf32>
    %29 = tpu.matmul %14, %28, %cst_24 {dimension_numbers = #tpu.dot_dimension_numbers<[1], [0], [0], [1], [0, 0, 1, 1], [], []>} : vector<16x64xbf16>, vector<64x384xbf16>, vector<16x384xf32> -> vector<16x384xf32>
    %c0_25 = arith.constant 0 : index
    %c0_26 = arith.constant 0 : index
    %30 = vector.load %arg11[%c0_25, %c0_26] : memref<1x384xf32, #tpu.memory_space<vmem>>, vector<1x384xf32>
    %31 = vector.broadcast %30 : vector<1x384xf32> to vector<16x384xf32>
    %32 = arith.addf %29, %31 : vector<16x384xf32>
    %c0_27 = arith.constant 0 : index
    %c0_28 = arith.constant 0 : index
    %33 = vector.load %arg12[%c0_27, %c0_28] : memref<64x384xbf16, #tpu.memory_space<vmem>>, vector<64x384xbf16>
    %c0_29 = arith.constant 0 : index
    %c0_30 = arith.constant 0 : index
    %34 = vector.load %arg13[%c0_29, %c0_30] : memref<1x64xf32, #tpu.memory_space<vmem>>, vector<1x64xf32>
    %35 = vector.shape_cast %34 : vector<1x64xf32> to vector<1x64xf32>
    %36 = vector.broadcast %35 : vector<1x64xf32> to vector<2x64xf32>
    %cst_31 = arith.constant 0.000000e+00 : f32
    %37 = vector.broadcast %cst_31 : f32 to vector<2x64xf32>
    %38 = vector.extract_strided_slice %32 {offsets = [0, 0], sizes = [2, 384], strides = [1, 1]} : vector<16x384xf32> to vector<2x384xf32>
    %39 = arith.truncf %37 : vector<2x64xf32> to vector<2x64xbf16>
    %cst_32 = arith.constant dense<0.000000e+00> : vector<2x384xf32>
    %40 = tpu.matmul %39, %33, %cst_32 {dimension_numbers = #tpu.dot_dimension_numbers<[1], [0], [0], [1], [0, 0, 1, 1], [], []>} : vector<2x64xbf16>, vector<64x384xbf16>, vector<2x384xf32> -> vector<2x384xf32>
    %41 = vector.extract_strided_slice %38 {offsets = [0, 0], sizes = [2, 64], strides = [1, 1]} : vector<2x384xf32> to vector<2x64xf32>
    %42 = vector.extract_strided_slice %40 {offsets = [0, 0], sizes = [2, 64], strides = [1, 1]} : vector<2x384xf32> to vector<2x64xf32>
    %43 = arith.addf %41, %42 : vector<2x64xf32>
    %44 = arith.negf %43 : vector<2x64xf32>
    %45 = math.exp %44 : vector<2x64xf32>
    %cst_33 = arith.constant 1.000000e+00 : f32
    %46 = vector.broadcast %cst_33 : f32 to vector<2x64xf32>
    %47 = arith.addf %46, %45 : vector<2x64xf32>
    %48 = arith.divf %46, %47 : vector<2x64xf32>
    %49 = vector.extract_strided_slice %38 {offsets = [0, 128], sizes = [2, 64], strides = [1, 1]} : vector<2x384xf32> to vector<2x64xf32>
    %50 = vector.extract_strided_slice %40 {offsets = [0, 128], sizes = [2, 64], strides = [1, 1]} : vector<2x384xf32> to vector<2x64xf32>
    %51 = arith.addf %49, %50 : vector<2x64xf32>
    %52 = arith.negf %51 : vector<2x64xf32>
    %53 = math.exp %52 : vector<2x64xf32>
    %cst_34 = arith.constant 1.000000e+00 : f32
    %54 = vector.broadcast %cst_34 : f32 to vector<2x64xf32>
    %55 = arith.addf %54, %53 : vector<2x64xf32>
    %56 = arith.divf %54, %55 : vector<2x64xf32>
    %57 = vector.extract_strided_slice %38 {offsets = [0, 256], sizes = [2, 64], strides = [1, 1]} : vector<2x384xf32> to vector<2x64xf32>
    %58 = vector.extract_strided_slice %40 {offsets = [0, 256], sizes = [2, 64], strides = [1, 1]} : vector<2x384xf32> to vector<2x64xf32>
    %59 = arith.addf %58, %36 : vector<2x64xf32>
    %60 = arith.mulf %48, %59 : vector<2x64xf32>
    %61 = arith.addf %57, %60 : vector<2x64xf32>
    %62 = math.tanh %61 : vector<2x64xf32>
    %cst_35 = arith.constant 1.000000e+00 : f32
    %63 = vector.broadcast %cst_35 : f32 to vector<2x64xf32>
    %64 = arith.subf %63, %56 : vector<2x64xf32>
    %65 = arith.mulf %64, %62 : vector<2x64xf32>
    %66 = arith.mulf %56, %37 : vector<2x64xf32>
    %67 = arith.addf %65, %66 : vector<2x64xf32>
    %68 = vector.extract_strided_slice %32 {offsets = [2, 0], sizes = [2, 384], strides = [1, 1]} : vector<16x384xf32> to vector<2x384xf32>
    %69 = arith.truncf %67 : vector<2x64xf32> to vector<2x64xbf16>
    %cst_36 = arith.constant dense<0.000000e+00> : vector<2x384xf32>
    %70 = tpu.matmul %69, %33, %cst_36 {dimension_numbers = #tpu.dot_dimension_numbers<[1], [0], [0], [1], [0, 0, 1, 1], [], []>} : vector<2x64xbf16>, vector<64x384xbf16>, vector<2x384xf32> -> vector<2x384xf32>
    %71 = vector.extract_strided_slice %68 {offsets = [0, 0], sizes = [2, 64], strides = [1, 1]} : vector<2x384xf32> to vector<2x64xf32>
    %72 = vector.extract_strided_slice %70 {offsets = [0, 0], sizes = [2, 64], strides = [1, 1]} : vector<2x384xf32> to vector<2x64xf32>
    %73 = arith.addf %71, %72 : vector<2x64xf32>
    %74 = arith.negf %73 : vector<2x64xf32>
    %75 = math.exp %74 : vector<2x64xf32>
    %cst_37 = arith.constant 1.000000e+00 : f32
    %76 = vector.broadcast %cst_37 : f32 to vector<2x64xf32>
    %77 = arith.addf %76, %75 : vector<2x64xf32>
    %78 = arith.divf %76, %77 : vector<2x64xf32>
    %79 = vector.extract_strided_slice %68 {offsets = [0, 128], sizes = [2, 64], strides = [1, 1]} : vector<2x384xf32> to vector<2x64xf32>
    %80 = vector.extract_strided_slice %70 {offsets = [0, 128], sizes = [2, 64], strides = [1, 1]} : vector<2x384xf32> to vector<2x64xf32>
    %81 = arith.addf %79, %80 : vector<2x64xf32>
    %82 = arith.negf %81 : vector<2x64xf32>
    %83 = math.exp %82 : vector<2x64xf32>
    %cst_38 = arith.constant 1.000000e+00 : f32
    %84 = vector.broadcast %cst_38 : f32 to vector<2x64xf32>
    %85 = arith.addf %84, %83 : vector<2x64xf32>
    %86 = arith.divf %84, %85 : vector<2x64xf32>
    %87 = vector.extract_strided_slice %68 {offsets = [0, 256], sizes = [2, 64], strides = [1, 1]} : vector<2x384xf32> to vector<2x64xf32>
    %88 = vector.extract_strided_slice %70 {offsets = [0, 256], sizes = [2, 64], strides = [1, 1]} : vector<2x384xf32> to vector<2x64xf32>
    %89 = arith.addf %88, %36 : vector<2x64xf32>
    %90 = arith.mulf %78, %89 : vector<2x64xf32>
    %91 = arith.addf %87, %90 : vector<2x64xf32>
    %92 = math.tanh %91 : vector<2x64xf32>
    %cst_39 = arith.constant 1.000000e+00 : f32
    %93 = vector.broadcast %cst_39 : f32 to vector<2x64xf32>
    %94 = arith.subf %93, %86 : vector<2x64xf32>
    %95 = arith.mulf %94, %92 : vector<2x64xf32>
    %96 = arith.mulf %86, %67 : vector<2x64xf32>
    %97 = arith.addf %95, %96 : vector<2x64xf32>
    %98 = vector.extract_strided_slice %32 {offsets = [4, 0], sizes = [2, 384], strides = [1, 1]} : vector<16x384xf32> to vector<2x384xf32>
    %99 = arith.truncf %97 : vector<2x64xf32> to vector<2x64xbf16>
    %cst_40 = arith.constant dense<0.000000e+00> : vector<2x384xf32>
    %100 = tpu.matmul %99, %33, %cst_40 {dimension_numbers = #tpu.dot_dimension_numbers<[1], [0], [0], [1], [0, 0, 1, 1], [], []>} : vector<2x64xbf16>, vector<64x384xbf16>, vector<2x384xf32> -> vector<2x384xf32>
    %101 = vector.extract_strided_slice %98 {offsets = [0, 0], sizes = [2, 64], strides = [1, 1]} : vector<2x384xf32> to vector<2x64xf32>
    %102 = vector.extract_strided_slice %100 {offsets = [0, 0], sizes = [2, 64], strides = [1, 1]} : vector<2x384xf32> to vector<2x64xf32>
    %103 = arith.addf %101, %102 : vector<2x64xf32>
    %104 = arith.negf %103 : vector<2x64xf32>
    %105 = math.exp %104 : vector<2x64xf32>
    %cst_41 = arith.constant 1.000000e+00 : f32
    %106 = vector.broadcast %cst_41 : f32 to vector<2x64xf32>
    %107 = arith.addf %106, %105 : vector<2x64xf32>
    %108 = arith.divf %106, %107 : vector<2x64xf32>
    %109 = vector.extract_strided_slice %98 {offsets = [0, 128], sizes = [2, 64], strides = [1, 1]} : vector<2x384xf32> to vector<2x64xf32>
    %110 = vector.extract_strided_slice %100 {offsets = [0, 128], sizes = [2, 64], strides = [1, 1]} : vector<2x384xf32> to vector<2x64xf32>
    %111 = arith.addf %109, %110 : vector<2x64xf32>
    %112 = arith.negf %111 : vector<2x64xf32>
    %113 = math.exp %112 : vector<2x64xf32>
    %cst_42 = arith.constant 1.000000e+00 : f32
    %114 = vector.broadcast %cst_42 : f32 to vector<2x64xf32>
    %115 = arith.addf %114, %113 : vector<2x64xf32>
    %116 = arith.divf %114, %115 : vector<2x64xf32>
    %117 = vector.extract_strided_slice %98 {offsets = [0, 256], sizes = [2, 64], strides = [1, 1]} : vector<2x384xf32> to vector<2x64xf32>
    %118 = vector.extract_strided_slice %100 {offsets = [0, 256], sizes = [2, 64], strides = [1, 1]} : vector<2x384xf32> to vector<2x64xf32>
    %119 = arith.addf %118, %36 : vector<2x64xf32>
    %120 = arith.mulf %108, %119 : vector<2x64xf32>
    %121 = arith.addf %117, %120 : vector<2x64xf32>
    %122 = math.tanh %121 : vector<2x64xf32>
    %cst_43 = arith.constant 1.000000e+00 : f32
    %123 = vector.broadcast %cst_43 : f32 to vector<2x64xf32>
    %124 = arith.subf %123, %116 : vector<2x64xf32>
    %125 = arith.mulf %124, %122 : vector<2x64xf32>
    %126 = arith.mulf %116, %97 : vector<2x64xf32>
    %127 = arith.addf %125, %126 : vector<2x64xf32>
    %128 = vector.extract_strided_slice %32 {offsets = [6, 0], sizes = [2, 384], strides = [1, 1]} : vector<16x384xf32> to vector<2x384xf32>
    %129 = arith.truncf %127 : vector<2x64xf32> to vector<2x64xbf16>
    %cst_44 = arith.constant dense<0.000000e+00> : vector<2x384xf32>
    %130 = tpu.matmul %129, %33, %cst_44 {dimension_numbers = #tpu.dot_dimension_numbers<[1], [0], [0], [1], [0, 0, 1, 1], [], []>} : vector<2x64xbf16>, vector<64x384xbf16>, vector<2x384xf32> -> vector<2x384xf32>
    %131 = vector.extract_strided_slice %128 {offsets = [0, 0], sizes = [2, 64], strides = [1, 1]} : vector<2x384xf32> to vector<2x64xf32>
    %132 = vector.extract_strided_slice %130 {offsets = [0, 0], sizes = [2, 64], strides = [1, 1]} : vector<2x384xf32> to vector<2x64xf32>
    %133 = arith.addf %131, %132 : vector<2x64xf32>
    %134 = arith.negf %133 : vector<2x64xf32>
    %135 = math.exp %134 : vector<2x64xf32>
    %cst_45 = arith.constant 1.000000e+00 : f32
    %136 = vector.broadcast %cst_45 : f32 to vector<2x64xf32>
    %137 = arith.addf %136, %135 : vector<2x64xf32>
    %138 = arith.divf %136, %137 : vector<2x64xf32>
    %139 = vector.extract_strided_slice %128 {offsets = [0, 128], sizes = [2, 64], strides = [1, 1]} : vector<2x384xf32> to vector<2x64xf32>
    %140 = vector.extract_strided_slice %130 {offsets = [0, 128], sizes = [2, 64], strides = [1, 1]} : vector<2x384xf32> to vector<2x64xf32>
    %141 = arith.addf %139, %140 : vector<2x64xf32>
    %142 = arith.negf %141 : vector<2x64xf32>
    %143 = math.exp %142 : vector<2x64xf32>
    %cst_46 = arith.constant 1.000000e+00 : f32
    %144 = vector.broadcast %cst_46 : f32 to vector<2x64xf32>
    %145 = arith.addf %144, %143 : vector<2x64xf32>
    %146 = arith.divf %144, %145 : vector<2x64xf32>
    %147 = vector.extract_strided_slice %128 {offsets = [0, 256], sizes = [2, 64], strides = [1, 1]} : vector<2x384xf32> to vector<2x64xf32>
    %148 = vector.extract_strided_slice %130 {offsets = [0, 256], sizes = [2, 64], strides = [1, 1]} : vector<2x384xf32> to vector<2x64xf32>
    %149 = arith.addf %148, %36 : vector<2x64xf32>
    %150 = arith.mulf %138, %149 : vector<2x64xf32>
    %151 = arith.addf %147, %150 : vector<2x64xf32>
    %152 = math.tanh %151 : vector<2x64xf32>
    %cst_47 = arith.constant 1.000000e+00 : f32
    %153 = vector.broadcast %cst_47 : f32 to vector<2x64xf32>
    %154 = arith.subf %153, %146 : vector<2x64xf32>
    %155 = arith.mulf %154, %152 : vector<2x64xf32>
    %156 = arith.mulf %146, %127 : vector<2x64xf32>
    %157 = arith.addf %155, %156 : vector<2x64xf32>
    %158 = vector.extract_strided_slice %32 {offsets = [8, 0], sizes = [2, 384], strides = [1, 1]} : vector<16x384xf32> to vector<2x384xf32>
    %159 = arith.truncf %157 : vector<2x64xf32> to vector<2x64xbf16>
    %cst_48 = arith.constant dense<0.000000e+00> : vector<2x384xf32>
    %160 = tpu.matmul %159, %33, %cst_48 {dimension_numbers = #tpu.dot_dimension_numbers<[1], [0], [0], [1], [0, 0, 1, 1], [], []>} : vector<2x64xbf16>, vector<64x384xbf16>, vector<2x384xf32> -> vector<2x384xf32>
    %161 = vector.extract_strided_slice %158 {offsets = [0, 0], sizes = [2, 64], strides = [1, 1]} : vector<2x384xf32> to vector<2x64xf32>
    %162 = vector.extract_strided_slice %160 {offsets = [0, 0], sizes = [2, 64], strides = [1, 1]} : vector<2x384xf32> to vector<2x64xf32>
    %163 = arith.addf %161, %162 : vector<2x64xf32>
    %164 = arith.negf %163 : vector<2x64xf32>
    %165 = math.exp %164 : vector<2x64xf32>
    %cst_49 = arith.constant 1.000000e+00 : f32
    %166 = vector.broadcast %cst_49 : f32 to vector<2x64xf32>
    %167 = arith.addf %166, %165 : vector<2x64xf32>
    %168 = arith.divf %166, %167 : vector<2x64xf32>
    %169 = vector.extract_strided_slice %158 {offsets = [0, 128], sizes = [2, 64], strides = [1, 1]} : vector<2x384xf32> to vector<2x64xf32>
    %170 = vector.extract_strided_slice %160 {offsets = [0, 128], sizes = [2, 64], strides = [1, 1]} : vector<2x384xf32> to vector<2x64xf32>
    %171 = arith.addf %169, %170 : vector<2x64xf32>
    %172 = arith.negf %171 : vector<2x64xf32>
    %173 = math.exp %172 : vector<2x64xf32>
    %cst_50 = arith.constant 1.000000e+00 : f32
    %174 = vector.broadcast %cst_50 : f32 to vector<2x64xf32>
    %175 = arith.addf %174, %173 : vector<2x64xf32>
    %176 = arith.divf %174, %175 : vector<2x64xf32>
    %177 = vector.extract_strided_slice %158 {offsets = [0, 256], sizes = [2, 64], strides = [1, 1]} : vector<2x384xf32> to vector<2x64xf32>
    %178 = vector.extract_strided_slice %160 {offsets = [0, 256], sizes = [2, 64], strides = [1, 1]} : vector<2x384xf32> to vector<2x64xf32>
    %179 = arith.addf %178, %36 : vector<2x64xf32>
    %180 = arith.mulf %168, %179 : vector<2x64xf32>
    %181 = arith.addf %177, %180 : vector<2x64xf32>
    %182 = math.tanh %181 : vector<2x64xf32>
    %cst_51 = arith.constant 1.000000e+00 : f32
    %183 = vector.broadcast %cst_51 : f32 to vector<2x64xf32>
    %184 = arith.subf %183, %176 : vector<2x64xf32>
    %185 = arith.mulf %184, %182 : vector<2x64xf32>
    %186 = arith.mulf %176, %157 : vector<2x64xf32>
    %187 = arith.addf %185, %186 : vector<2x64xf32>
    %188 = vector.extract_strided_slice %32 {offsets = [10, 0], sizes = [2, 384], strides = [1, 1]} : vector<16x384xf32> to vector<2x384xf32>
    %189 = arith.truncf %187 : vector<2x64xf32> to vector<2x64xbf16>
    %cst_52 = arith.constant dense<0.000000e+00> : vector<2x384xf32>
    %190 = tpu.matmul %189, %33, %cst_52 {dimension_numbers = #tpu.dot_dimension_numbers<[1], [0], [0], [1], [0, 0, 1, 1], [], []>} : vector<2x64xbf16>, vector<64x384xbf16>, vector<2x384xf32> -> vector<2x384xf32>
    %191 = vector.extract_strided_slice %188 {offsets = [0, 0], sizes = [2, 64], strides = [1, 1]} : vector<2x384xf32> to vector<2x64xf32>
    %192 = vector.extract_strided_slice %190 {offsets = [0, 0], sizes = [2, 64], strides = [1, 1]} : vector<2x384xf32> to vector<2x64xf32>
    %193 = arith.addf %191, %192 : vector<2x64xf32>
    %194 = arith.negf %193 : vector<2x64xf32>
    %195 = math.exp %194 : vector<2x64xf32>
    %cst_53 = arith.constant 1.000000e+00 : f32
    %196 = vector.broadcast %cst_53 : f32 to vector<2x64xf32>
    %197 = arith.addf %196, %195 : vector<2x64xf32>
    %198 = arith.divf %196, %197 : vector<2x64xf32>
    %199 = vector.extract_strided_slice %188 {offsets = [0, 128], sizes = [2, 64], strides = [1, 1]} : vector<2x384xf32> to vector<2x64xf32>
    %200 = vector.extract_strided_slice %190 {offsets = [0, 128], sizes = [2, 64], strides = [1, 1]} : vector<2x384xf32> to vector<2x64xf32>
    %201 = arith.addf %199, %200 : vector<2x64xf32>
    %202 = arith.negf %201 : vector<2x64xf32>
    %203 = math.exp %202 : vector<2x64xf32>
    %cst_54 = arith.constant 1.000000e+00 : f32
    %204 = vector.broadcast %cst_54 : f32 to vector<2x64xf32>
    %205 = arith.addf %204, %203 : vector<2x64xf32>
    %206 = arith.divf %204, %205 : vector<2x64xf32>
    %207 = vector.extract_strided_slice %188 {offsets = [0, 256], sizes = [2, 64], strides = [1, 1]} : vector<2x384xf32> to vector<2x64xf32>
    %208 = vector.extract_strided_slice %190 {offsets = [0, 256], sizes = [2, 64], strides = [1, 1]} : vector<2x384xf32> to vector<2x64xf32>
    %209 = arith.addf %208, %36 : vector<2x64xf32>
    %210 = arith.mulf %198, %209 : vector<2x64xf32>
    %211 = arith.addf %207, %210 : vector<2x64xf32>
    %212 = math.tanh %211 : vector<2x64xf32>
    %cst_55 = arith.constant 1.000000e+00 : f32
    %213 = vector.broadcast %cst_55 : f32 to vector<2x64xf32>
    %214 = arith.subf %213, %206 : vector<2x64xf32>
    %215 = arith.mulf %214, %212 : vector<2x64xf32>
    %216 = arith.mulf %206, %187 : vector<2x64xf32>
    %217 = arith.addf %215, %216 : vector<2x64xf32>
    %218 = vector.extract_strided_slice %32 {offsets = [12, 0], sizes = [2, 384], strides = [1, 1]} : vector<16x384xf32> to vector<2x384xf32>
    %219 = arith.truncf %217 : vector<2x64xf32> to vector<2x64xbf16>
    %cst_56 = arith.constant dense<0.000000e+00> : vector<2x384xf32>
    %220 = tpu.matmul %219, %33, %cst_56 {dimension_numbers = #tpu.dot_dimension_numbers<[1], [0], [0], [1], [0, 0, 1, 1], [], []>} : vector<2x64xbf16>, vector<64x384xbf16>, vector<2x384xf32> -> vector<2x384xf32>
    %221 = vector.extract_strided_slice %218 {offsets = [0, 0], sizes = [2, 64], strides = [1, 1]} : vector<2x384xf32> to vector<2x64xf32>
    %222 = vector.extract_strided_slice %220 {offsets = [0, 0], sizes = [2, 64], strides = [1, 1]} : vector<2x384xf32> to vector<2x64xf32>
    %223 = arith.addf %221, %222 : vector<2x64xf32>
    %224 = arith.negf %223 : vector<2x64xf32>
    %225 = math.exp %224 : vector<2x64xf32>
    %cst_57 = arith.constant 1.000000e+00 : f32
    %226 = vector.broadcast %cst_57 : f32 to vector<2x64xf32>
    %227 = arith.addf %226, %225 : vector<2x64xf32>
    %228 = arith.divf %226, %227 : vector<2x64xf32>
    %229 = vector.extract_strided_slice %218 {offsets = [0, 128], sizes = [2, 64], strides = [1, 1]} : vector<2x384xf32> to vector<2x64xf32>
    %230 = vector.extract_strided_slice %220 {offsets = [0, 128], sizes = [2, 64], strides = [1, 1]} : vector<2x384xf32> to vector<2x64xf32>
    %231 = arith.addf %229, %230 : vector<2x64xf32>
    %232 = arith.negf %231 : vector<2x64xf32>
    %233 = math.exp %232 : vector<2x64xf32>
    %cst_58 = arith.constant 1.000000e+00 : f32
    %234 = vector.broadcast %cst_58 : f32 to vector<2x64xf32>
    %235 = arith.addf %234, %233 : vector<2x64xf32>
    %236 = arith.divf %234, %235 : vector<2x64xf32>
    %237 = vector.extract_strided_slice %218 {offsets = [0, 256], sizes = [2, 64], strides = [1, 1]} : vector<2x384xf32> to vector<2x64xf32>
    %238 = vector.extract_strided_slice %220 {offsets = [0, 256], sizes = [2, 64], strides = [1, 1]} : vector<2x384xf32> to vector<2x64xf32>
    %239 = arith.addf %238, %36 : vector<2x64xf32>
    %240 = arith.mulf %228, %239 : vector<2x64xf32>
    %241 = arith.addf %237, %240 : vector<2x64xf32>
    %242 = math.tanh %241 : vector<2x64xf32>
    %cst_59 = arith.constant 1.000000e+00 : f32
    %243 = vector.broadcast %cst_59 : f32 to vector<2x64xf32>
    %244 = arith.subf %243, %236 : vector<2x64xf32>
    %245 = arith.mulf %244, %242 : vector<2x64xf32>
    %246 = arith.mulf %236, %217 : vector<2x64xf32>
    %247 = arith.addf %245, %246 : vector<2x64xf32>
    %248 = vector.extract_strided_slice %32 {offsets = [14, 0], sizes = [2, 384], strides = [1, 1]} : vector<16x384xf32> to vector<2x384xf32>
    %249 = arith.truncf %247 : vector<2x64xf32> to vector<2x64xbf16>
    %cst_60 = arith.constant dense<0.000000e+00> : vector<2x384xf32>
    %250 = tpu.matmul %249, %33, %cst_60 {dimension_numbers = #tpu.dot_dimension_numbers<[1], [0], [0], [1], [0, 0, 1, 1], [], []>} : vector<2x64xbf16>, vector<64x384xbf16>, vector<2x384xf32> -> vector<2x384xf32>
    %251 = vector.extract_strided_slice %248 {offsets = [0, 0], sizes = [2, 64], strides = [1, 1]} : vector<2x384xf32> to vector<2x64xf32>
    %252 = vector.extract_strided_slice %250 {offsets = [0, 0], sizes = [2, 64], strides = [1, 1]} : vector<2x384xf32> to vector<2x64xf32>
    %253 = arith.addf %251, %252 : vector<2x64xf32>
    %254 = arith.negf %253 : vector<2x64xf32>
    %255 = math.exp %254 : vector<2x64xf32>
    %cst_61 = arith.constant 1.000000e+00 : f32
    %256 = vector.broadcast %cst_61 : f32 to vector<2x64xf32>
    %257 = arith.addf %256, %255 : vector<2x64xf32>
    %258 = arith.divf %256, %257 : vector<2x64xf32>
    %259 = vector.extract_strided_slice %248 {offsets = [0, 128], sizes = [2, 64], strides = [1, 1]} : vector<2x384xf32> to vector<2x64xf32>
    %260 = vector.extract_strided_slice %250 {offsets = [0, 128], sizes = [2, 64], strides = [1, 1]} : vector<2x384xf32> to vector<2x64xf32>
    %261 = arith.addf %259, %260 : vector<2x64xf32>
    %262 = arith.negf %261 : vector<2x64xf32>
    %263 = math.exp %262 : vector<2x64xf32>
    %cst_62 = arith.constant 1.000000e+00 : f32
    %264 = vector.broadcast %cst_62 : f32 to vector<2x64xf32>
    %265 = arith.addf %264, %263 : vector<2x64xf32>
    %266 = arith.divf %264, %265 : vector<2x64xf32>
    %267 = vector.extract_strided_slice %248 {offsets = [0, 256], sizes = [2, 64], strides = [1, 1]} : vector<2x384xf32> to vector<2x64xf32>
    %268 = vector.extract_strided_slice %250 {offsets = [0, 256], sizes = [2, 64], strides = [1, 1]} : vector<2x384xf32> to vector<2x64xf32>
    %269 = arith.addf %268, %36 : vector<2x64xf32>
    %270 = arith.mulf %258, %269 : vector<2x64xf32>
    %271 = arith.addf %267, %270 : vector<2x64xf32>
    %272 = math.tanh %271 : vector<2x64xf32>
    %cst_63 = arith.constant 1.000000e+00 : f32
    %273 = vector.broadcast %cst_63 : f32 to vector<2x64xf32>
    %274 = arith.subf %273, %266 : vector<2x64xf32>
    %275 = arith.mulf %274, %272 : vector<2x64xf32>
    %276 = arith.mulf %266, %247 : vector<2x64xf32>
    %277 = arith.addf %275, %276 : vector<2x64xf32>
    %278 = arith.truncf %277 : vector<2x64xf32> to vector<2x64xbf16>
    %c0_64 = arith.constant 0 : index
    %c0_65 = arith.constant 0 : index
    %279 = vector.load %arg14[%c0_64, %c0_65] : memref<64x128xbf16, #tpu.memory_space<vmem>>, vector<64x128xbf16>
    %cst_66 = arith.constant dense<0.000000e+00> : vector<2x128xf32>
    %280 = tpu.matmul %278, %279, %cst_66 {dimension_numbers = #tpu.dot_dimension_numbers<[1], [0], [0], [1], [0, 0, 1, 1], [], []>} : vector<2x64xbf16>, vector<64x128xbf16>, vector<2x128xf32> -> vector<2x128xf32>
    %c0_67 = arith.constant 0 : index
    %c0_68 = arith.constant 0 : index
    %281 = vector.load %arg1[%c0_67, %c0_68] : memref<2x370xf32, #tpu.memory_space<vmem>>, vector<2x370xf32>
    %282 = arith.truncf %281 : vector<2x370xf32> to vector<2x370xbf16>
    %c0_69 = arith.constant 0 : index
    %c0_70 = arith.constant 0 : index
    %283 = vector.load %arg15[%c0_69, %c0_70] : memref<370x128xbf16, #tpu.memory_space<vmem>>, vector<370x128xbf16>
    %cst_71 = arith.constant dense<0.000000e+00> : vector<2x128xf32>
    %284 = tpu.matmul %282, %283, %cst_71 {dimension_numbers = #tpu.dot_dimension_numbers<[1], [0], [0], [1], [0, 0, 1, 1], [], []>} : vector<2x370xbf16>, vector<370x128xbf16>, vector<2x128xf32> -> vector<2x128xf32>
    %285 = arith.addf %280, %284 : vector<2x128xf32>
    %c0_72 = arith.constant 0 : index
    %c0_73 = arith.constant 0 : index
    %286 = vector.load %arg16[%c0_72, %c0_73] : memref<1x128xf32, #tpu.memory_space<vmem>>, vector<1x128xf32>
    %287 = vector.broadcast %286 : vector<1x128xf32> to vector<2x128xf32>
    %288 = arith.addf %285, %287 : vector<2x128xf32>
    %289 = arith.truncf %288 : vector<2x128xf32> to vector<2x128xbf16>
    %c0_74 = arith.constant 0 : index
    %c0_75 = arith.constant 0 : index
    %290 = vector.load %arg17[%c0_74, %c0_75] : memref<128x32xbf16, #tpu.memory_space<vmem>>, vector<128x32xbf16>
    %cst_76 = arith.constant dense<0.000000e+00> : vector<2x32xf32>
    %291 = tpu.matmul %289, %290, %cst_76 {dimension_numbers = #tpu.dot_dimension_numbers<[1], [0], [0], [1], [0, 0, 1, 1], [], []>} : vector<2x128xbf16>, vector<128x32xbf16>, vector<2x32xf32> -> vector<2x32xf32>
    %c0_77 = arith.constant 0 : index
    %c0_78 = arith.constant 0 : index
    %292 = vector.load %arg18[%c0_77, %c0_78] : memref<1x32xf32, #tpu.memory_space<vmem>>, vector<1x32xf32>
    %293 = vector.broadcast %292 : vector<1x32xf32> to vector<2x32xf32>
    %294 = arith.addf %291, %293 : vector<2x32xf32>
    %cst_79 = arith.constant 0.000000e+00 : f32
    %295 = vector.broadcast %cst_79 : f32 to vector<2x32xf32>
    %296 = arith.maximumf %294, %295 : vector<2x32xf32>
    %297 = arith.truncf %296 : vector<2x32xf32> to vector<2x32xbf16>
    %c0_80 = arith.constant 0 : index
    %c0_81 = arith.constant 0 : index
    %298 = vector.load %arg19[%c0_80, %c0_81] : memref<32x2xbf16, #tpu.memory_space<vmem>>, vector<32x2xbf16>
    %cst_82 = arith.constant dense<0.000000e+00> : vector<2x2xf32>
    %299 = tpu.matmul %297, %298, %cst_82 {dimension_numbers = #tpu.dot_dimension_numbers<[1], [0], [0], [1], [0, 0, 1, 1], [], []>} : vector<2x32xbf16>, vector<32x2xbf16>, vector<2x2xf32> -> vector<2x2xf32>
    %c0_83 = arith.constant 0 : index
    %c0_84 = arith.constant 0 : index
    %300 = vector.load %arg20[%c0_83, %c0_84] : memref<1x2xf32, #tpu.memory_space<vmem>>, vector<1x2xf32>
    %301 = vector.broadcast %300 : vector<1x2xf32> to vector<2x2xf32>
    %302 = arith.addf %299, %301 : vector<2x2xf32>
    %c0_85 = arith.constant 0 : index
    %c0_86 = arith.constant 0 : index
    %303 = vector.load %arg22[%c0_85, %c0_86] : memref<2x2xf32, #tpu.memory_space<vmem>>, vector<2x2xf32>
    tpu.vector_store %arg22[%c0_85, %c0_86], %302 {strides = array<i32>} : memref<2x2xf32, #tpu.memory_space<vmem>>, vector<2x2xf32>,
    return
  }
}

</mosaic_0001>

<bundles_post_ra>
// kernel: gru_model_forward.1
= control target key start
LH: loop header
LB: loop body
LE: loop exit
PB: predicated region body
PF: predicated region fallthrough
CT: control target
= control target key end

     0   :  { %s4947_s0 = inlined_call_operand.vmem [shape: f32[16,370], index: 0, kind: input, shape index: {}]   ;;  %s4948_s1 = inlined_call_operand.hbm [shape: f32[2,370], index: 1, kind: input, shape index: {}]   ;;  %s4949_s2 = inlined_call_operand.vmem [shape: bf16[370,154], index: 2, kind: input, shape index: {}]   ;;  %s4950_s3 = inlined_call_operand.hbm [shape: f32[1,154], index: 3, kind: input, shape index: {}]   ;;  %s4951_s4 = inlined_call_operand.vmem [shape: bf16[154,64], index: 4, kind: input, shape index: {}]   ;;  %s4952_s5 = inlined_call_operand.vmem [shape: f32[1,64], index: 5, kind: input, shape index: {}]   ;;  %s4953_s6 = inlined_call_operand.vmem [shape: bf16[64,154], index: 6, kind: input, shape index: {}]   ;;  %s4954_s7 = inlined_call_operand.hbm [shape: f32[1,154], index: 7, kind: input, shape index: {}]   ;;  %s4955_s8 = inlined_call_operand.vmem [shape: bf16[154,384], index: 8, kind: input, shape index: {}]   ;;  %s4956_s9 = inlined_call_operand.hbm [shape: f32[1,384], index: 9, kind: input, shape index: {}]   ;;  %s4957_s10 = inlined_call_operand.vmem [shape: bf16[64,384], index: 10, kind: input, shape index: {}]   ;;  %s4958_s11 = inlined_call_operand.hbm [shape: f32[1,384], index: 11, kind: input, shape index: {}]   ;;  %s4959_s12 = inlined_call_operand.vmem [shape: bf16[64,384], index: 12, kind: input, shape index: {}]   ;;  %s4960_s13 = inlined_call_operand.hbm [shape: f32[1,64], index: 13, kind: input, shape index: {}]   ;;  %s4961_s14 = inlined_call_operand.vmem [shape: bf16[64,128], index: 14, kind: input, shape index: {}]   ;;  %s4962_s15 = inlined_call_operand.vmem [shape: bf16[370,128], index: 15, kind: input, shape index: {}]   ;;  %s4963_s16 = inlined_call_operand.hbm [shape: f32[1,128], index: 16, kind: input, shape index: {}]   ;;  %s4964_s17 = inlined_call_operand.vmem [shape: bf16[128,32], index: 17, kind: input, shape index: {}]   ;;  %s4965_s18 = inlined_call_operand.hbm [shape: f32[1,32], index: 18, kind: input, shape index: {}]   ;;  %s4966_s19 = inlined_call_operand.vmem [shape: bf16[32,2], index: 19, kind: input, shape index: {}]   ;;  %s4967_s20 = inlined_call_operand.hbm [shape: f32[1,2], index: 20, kind: input, shape index: {}]   ;;  %s4968_s21 = inlined_call_operand.vmem [shape: f32[16,384], index: 21, kind: output, shape index: {0}]   ;;  %s4969_s22 = inlined_call_operand.hbm [shape: f32[2,2], index: 22, kind: output, shape index: {1}]  }
   0x1   :  { %4974 = sst [smem:[#allocation24_spill]] %s4947_s0 }
   0x2   :  { %4975 = sst [smem:[#allocation25_spill]] %s4948_s1 }
   0x3   :  { %4976 = sst [smem:[#allocation26_spill]] %s4949_s2 }
   0x4   :  { %4977 = sst [smem:[#allocation27_spill]] %s4950_s3 }
   0x5   :  { %4978 = sst [smem:[#allocation28_spill]] %s4951_s4 }
   0x6   :  { %4979 = sst [smem:[#allocation29_spill]] %s4952_s5 }
   0x7   :  { %4980 = sst [smem:[#allocation30_spill]] %s4953_s6 }
   0x8   :  { %28 = vsyncpa [#allocation3], 0 }
   0x9   :  { %29 = vsyncpa [#allocation6], 0 }
   0xa   :  { %30 = vsyncpa [#allocation9], 0 }
   0xb   :  { %31 = vsyncpa [#allocation12], 0 }
   0xc   :  { %32 = vsyncpa [#allocation15], 0 }
   0xd   :  { %33 = vsyncpa [#allocation4], 0  ;;  %s3937_s3 = smov [#allocation5]   ;;  %s3938_s29 = smov [#allocation8]  }
   0xe   :  { %s54_s28 = sshll.u32 %s3937_s3, 4  ;;  %s82_s30 = sshll.u32 %s3938_s29, 4  ;;  %s55_s28 = int_to_ptr.vmem [resolvable:$true] %s54_s28  ;;  %s83_s30 = int_to_ptr.vmem [resolvable:$true] %s82_s30 }
   0xf   :  { %s3733_s4 = scalar_lea.vmem %s55_s28, 32  ;;  %p3738_p1 = scmp.lt.s32.totalorder %s55_s28, %s55_s28 }
  0x10   :  { %p3734_p0 = scmp.ne.s32.totalorder %s55_s28, %s3733_s4  ;;  %p3739_p2 = scmp.lt.s32.totalorder %s3733_s4, %s3733_s4 }
  0x12   :  { %p3740_p3 = por %p3739_p2, %p3738_p1 }
  0x14   :  { %p3741_p4 = pnand %p3740_p3, %p3734_p0 }
  0x16   :  { %3744 = shalt.err (!%p3741_p4)
}
  0x17   :  { %s4981_s1 = sld [smem:[#allocation27_spill]]  ;;  %s3753_s5 = scalar_lea.vmem %s83_s30, 48 }
  0x18   :  { %p3754_p5 = scmp.ne.s32.totalorder %s83_s30, %s3753_s5  ;;  %s3757_s24 = scalar_lea.vmem %s83_s30, 64 }
  0x19   :  { %p3758_p6 = scmp.lt.s32.totalorder %s83_s30, %s83_s30  ;;  %p3759_p7 = scmp.lt.s32.totalorder %s3757_s24, %s3753_s5 }
  0x1b   :  { %p3760_p8 = por %p3759_p7, %p3758_p6 }
  0x1d   :  { %57 = dma.hbm_to_vmem [thread:$0]  %s4981_s1, 32, %s55_s28, [#allocation6]  }
  0x1e   :  { %p3761_p9 = pnand %p3760_p8, %p3754_p5 }
  0x20   :  { %3764 = shalt.err (!%p3761_p9)
}
  0x21   :  { %85 = dma.hbm_to_vmem [thread:$0]  %s4956_s9, 48, %s83_s30, [#allocation9]  }
  0x22   :  { %s3939_s26 = smov [#allocation11]   ;;  %s3940_s27 = smov [#allocation14]  }
  0x23   :  { %s106_s2 = sshll.u32 %s3939_s26, 4  ;;  %s132_s3 = sshll.u32 %s3940_s27, 4  ;;  %s107_s2 = int_to_ptr.vmem [resolvable:$true] %s106_s2  ;;  %s133_s3 = int_to_ptr.vmem [resolvable:$true] %s132_s3 }
  0x24   :  { %s3773_s29 = scalar_lea.vmem %s107_s2, 16  ;;  %s3777_s28 = scalar_lea.vmem %s107_s2, 32 }
  0x25   :  { %p3774_p10 = scmp.ne.s32.totalorder %s107_s2, %s3773_s29  ;;  %p3778_p11 = scmp.lt.s32.totalorder %s107_s2, %s107_s2 }
  0x26   :  { %p3779_p12 = scmp.lt.s32.totalorder %s3777_s28, %s3773_s29 }
  0x28   :  { %p3780_p13 = por %p3779_p12, %p3778_p11 }
  0x2a   :  { %p3781_p0 = pnand %p3780_p13, %p3774_p10 }
  0x2c   :  { %3784 = shalt.err (!%p3781_p0)
}
  0x2d   :  { %109 = dma.hbm_to_vmem [thread:$0]  %s4960_s13, 16, %s107_s2, [#allocation12]  }
  0x2e   :  { %s3793_s23 = scalar_lea.vmem %s133_s3, 16  ;;  %s3797_s9 = scalar_lea.vmem %s133_s3, 32 }
  0x2f   :  { %p3794_p1 = scmp.ne.s32.totalorder %s133_s3, %s3793_s23  ;;  %p3798_p2 = scmp.lt.s32.totalorder %s133_s3, %s133_s3 }
  0x30   :  { %p3799_p3 = scmp.lt.s32.totalorder %s3797_s9, %s3793_s23 }
  0x32   :  { %p3800_p4 = por %p3799_p3, %p3798_p2 }
  0x34   :  { %p3801_p5 = pnand %p3800_p4, %p3794_p1 }
  0x36   :  { %3804 = shalt.err (!%p3801_p5)
}
  0x37   :  { %135 = dma.hbm_to_vmem [thread:$0]  %s4965_s18, 16, %s133_s3, [#allocation15]  }
  0x38   :  { %s3941_s5 = smov [#allocation2]   ;;  %s3942_s6 = smov [#allocation7]  }
  0x39   :  { %s42_s24 = sshll.u32 %s3941_s5, 4  ;;  %s70_s25 = sshll.u32 %s3942_s6, 4  ;;  %s43_s24 = int_to_ptr.vmem [resolvable:$true] %s42_s24  ;;  %s71_s25 = int_to_ptr.vmem [resolvable:$true] %s70_s25 }
  0x3a   :  { %s3813_s26 = scalar_lea.vmem %s43_s24, 96  ;;  %p3818_p7 = scmp.lt.s32.totalorder %s43_s24, %s43_s24 }
  0x3b   :  { %p3814_p6 = scmp.ne.s32.totalorder %s43_s24, %s3813_s26  ;;  %p3819_p8 = scmp.lt.s32.totalorder %s3813_s26, %s3813_s26 }
  0x3d   :  { %p3820_p9 = por %p3819_p8, %p3818_p7 }
  0x3f   :  { %p3821_p10 = pnand %p3820_p9, %p3814_p6 }
  0x41   :  { %3824 = shalt.err (!%p3821_p10)
}
  0x42   :  { %s4982_s27 = sld [smem:[#allocation25_spill]]  ;;  %s3833_s29 = scalar_lea.vmem %s71_s25, 32 }
  0x43   :  { %p3834_p11 = scmp.ne.s32.totalorder %s71_s25, %s3833_s29  ;;  %p3838_p12 = scmp.lt.s32.totalorder %s71_s25, %s71_s25 }
  0x44   :  { %p3839_p13 = scmp.lt.s32.totalorder %s3833_s29, %s3833_s29 }
  0x46   :  { %p3840_p0 = por %p3839_p13, %p3838_p12 }
  0x48   :  { %45 = dma.hbm_to_vmem [thread:$0]  %s4982_s27, 96, %s43_s24, [#allocation3]  }
  0x49   :  { %p3841_p1 = pnand %p3840_p0, %p3834_p11 }
  0x4b   :  { %3844 = shalt.err (!%p3841_p1)
}
  0x4c   :  { %73 = dma.hbm_to_vmem [thread:$0]  %s4954_s7, 32, %s71_s25, [#allocation6]  }
  0x4d   :  { %s3943_s28 = smov [#allocation10]   ;;  %s3944_s0 = smov [#allocation13]  }
  0x4e   :  { %s94_s4 = sshll.u32 %s3943_s28, 4  ;;  %s120_s23 = sshll.u32 %s3944_s0, 4  ;;  %s95_s4 = int_to_ptr.vmem [resolvable:$true] %s94_s4  ;;  %s121_s23 = int_to_ptr.vmem [resolvable:$true] %s120_s23 }
  0x4f   :  { %s3853_s9 = scalar_lea.vmem %s95_s4, 48  ;;  %s3857_s30 = scalar_lea.vmem %s95_s4, 64 }
  0x50   :  { %p3854_p2 = scmp.ne.s32.totalorder %s95_s4, %s3853_s9  ;;  %p3858_p3 = scmp.lt.s32.totalorder %s95_s4, %s95_s4 }
  0x51   :  { %p3859_p4 = scmp.lt.s32.totalorder %s3857_s30, %s3853_s9 }
  0x53   :  { %p3860_p5 = por %p3859_p4, %p3858_p3 }
  0x55   :  { %p3861_p6 = pnand %p3860_p5, %p3854_p2 }
  0x57   :  { %3864 = shalt.err (!%p3861_p6)
}
  0x58   :  { %97 = dma.hbm_to_vmem [thread:$0]  %s4958_s11, 48, %s95_s4, [#allocation9]  }
  0x59   :  { %s3873_s24 = scalar_lea.vmem %s121_s23, 16  ;;  %s3877_s7 = scalar_lea.vmem %s121_s23, 32 }
  0x5a   :  { %p3874_p7 = scmp.ne.s32.totalorder %s121_s23, %s3873_s24  ;;  %p3878_p8 = scmp.lt.s32.totalorder %s121_s23, %s121_s23 }
  0x5b   :  { %p3879_p9 = scmp.lt.s32.totalorder %s3877_s7, %s3873_s24 }
  0x5d   :  { %p3880_p10 = por %p3879_p9, %p3878_p8 }
  0x5f   :  { %p3881_p11 = pnand %p3880_p10, %p3874_p7 }
  0x61   :  { %3884 = shalt.err (!%p3881_p11)
}
  0x62   :  { %123 = dma.hbm_to_vmem [thread:$0]  %s4963_s16, 16, %s121_s23, [#allocation12]  }
  0x63   :  { %s3945_s26 = smov [#allocation16]  }
  0x64   :  { %s144_s13 = sshll.u32 %s3945_s26, 4  ;;  %s145_s13 = int_to_ptr.vmem [resolvable:$true] %s144_s13 }
  0x65   :  { %s3893_s2 = scalar_lea.vmem %s145_s13, 16  ;;  %s3897_s27 = scalar_lea.vmem %s145_s13, 32 }
  0x66   :  { %p3894_p12 = scmp.ne.s32.totalorder %s145_s13, %s3893_s2  ;;  %p3898_p13 = scmp.lt.s32.totalorder %s145_s13, %s145_s13 }
  0x67   :  { %p3899_p0 = scmp.lt.s32.totalorder %s3897_s27, %s3893_s2 }
  0x69   :  { %p3900_p1 = por %p3899_p0, %p3898_p13 }
  0x6b   :  { %p3901_p2 = pnand %p3900_p1, %p3894_p12 }
  0x6d   :  { %3904 = shalt.err (!%p3901_p2)
}
  0x6e   :  { %147 = dma.hbm_to_vmem [thread:$0]  %s4967_s20, 16, %s145_s13, [#allocation15]  }
  0x6f   :  { %3925 = dma.done.wait [#allocation3], 96  }
  0x70   :  { %3926 = vsyncadd [#allocation3], 4294967200 }
  0x71   :  { %3927 = dma.done.wait [#allocation6], 64  }
  0x72   :  { %3928 = vsyncadd [#allocation6], 4294967232 }
  0x73   :  { %3929 = dma.done.wait [#allocation9], 96  }
  0x74   :  { %3930 = vsyncadd [#allocation9], 4294967200 }
  0x75   :  { %3931 = dma.done.wait [#allocation12], 32  }
  0x76   :  { %3932 = vsyncadd [#allocation12], 4294967264 }
  0x77   :  { %3933 = dma.done.wait [#allocation15], 32  }
  0x78   :  { %3934 = vsyncadd [#allocation15], 4294967264  ;;  %v3946_v0 = vmov 0   ;;  %s4983_s3 = sld [smem:[#allocation26_spill]]  ;;  %vm483_vm0 = vcmask 1040384   ;;  %vm479_vm1 = vcmask 932864  }
  0x79   :  { %565 = vmatprep.mubr.bf16.mxu1 %v3946_v0  ;;  %s4984_s29 = sld [smem:[#allocation24_spill]]  ;;  %vm672_vm2 = vcmask 1044480   ;;  %vm668_vm3 = vcmask 211968   ;;  %vm778_vm4 = vcmask 523264   ;;  %vm3948_vm5 = vmmov 0  }
  0x7a   :  { %s4985_s20 = sld [smem:[#allocation28_spill]]  ;;  %vm2876_vm6 = vcmask 261120   ;;  %vm2920_vm7 = vcmask 9216  }
  0x7b   :  { %s4986_s9 = sld [smem:[#allocation30_spill]] }
  0x7c   :  { %s4987_s26 = sld [smem:[#allocation29_spill]] }
  0x7e   :  { %v3425_v1 = vld [vmem:[%s4983_s3 + $0x74] ss:$8 sps:$4 sm:$0xff]   ;;  %v3427_v2 = vld [vmem:[%s4983_s3 + $0x70] ss:$8 sps:$4 sm:$0xff]   ;;  %v3428_v3 = vld [vmem:[%s4983_s3 + $0x64] ss:$8 sps:$4 sm:$0xff]  }
  0x7f   :  { %490 = vmatprep.subr.bf16.mxu0 %v3425_v1  ;;  %v3430_v4 = vld [vmem:[%s4983_s3 + $0x60] ss:$8 sps:$4 sm:$0xff]   ;;  %v3431_v5 = vld [vmem:[%s4983_s3 + $0x54] ss:$8 sps:$4 sm:$0xff]   ;;  %v3433_v6 = vld [vmem:[%s4983_s3 + $0x50] ss:$8 sps:$4 sm:$0xff]  }
  0x80   :  { %491 = vmatpush1.bf16.msra.mxu0 %v3427_v2  ;;  %v3434_v7 = vld [vmem:[%s4983_s3 + $0x44] ss:$8 sps:$4 sm:$0xff]   ;;  %v3436_v8 = vld [vmem:[%s4983_s3 + $0x40] ss:$8 sps:$4 sm:$0xff]   ;;  %v231_v9 = vld [vmem:[%s4983_s3 + $0x170] sm:$0x11] }
  0x81   :  { %492 = vmatprep.subr.bf16.mxu0 %v3428_v3  ;;  %v3437_v10 = vld [vmem:[%s4983_s3 + $0x34] ss:$8 sps:$4 sm:$0xff]   ;;  %v2992_v11 = vcombine.high %v231_v9, %v231_v9  ;;  %v2991_v12 = vcombine.low %v231_v9, %v231_v9  ;;  %v3453_v13 = vld [vmem:[%s4983_s3 + $0x164] ss:$8 sps:$4 sm:$0xff]   ;;  %v3456_v15 = vld [vmem:[%s4983_s3 + $0x160] ss:$8 sps:$4 sm:$0xff]  }
  0x82   :  { %v3439_v16 = vld [vmem:[%s4983_s3 + $0x30] ss:$8 sps:$4 sm:$0xff]   ;;  %v3459_v17 = vld [vmem:[%s4983_s3 + $0x154] ss:$8 sps:$4 sm:$0xff]   ;;  %v3440_v18 = vld [vmem:[%s4983_s3 + $0x24] ss:$8 sps:$4 sm:$0xff]  }
  0x83   :  { %2993 = vmatprep.subr.msk.bf16.mxu1 %vm483_vm0, %v2992_v11  ;;  %v485_v14 = vsel %vm483_vm0, %v2991_v12, 0  ;;  %v3442_v19 = vld [vmem:[%s4983_s3 + $0x20] ss:$8 sps:$4 sm:$0xff]   ;;  %v3462_v20 = vld [vmem:[%s4983_s3 + $0x150] ss:$8 sps:$4 sm:$0xff]   ;;  %v234_v12 = vlaneseq }
  0x84   :  { %493 = vmatpush1.bf16.msra.mxu0 %v3430_v4  ;;  %534 = vmatpush1.bf16.msra.mxu1 %v485_v14  ;;  %v3465_v21 = vld [vmem:[%s4983_s3 + $0x144] ss:$8 sps:$4 sm:$0xff]   ;;  %v3443_v22 = vld [vmem:[%s4983_s3 + $0x14] ss:$8 sps:$4 sm:$0xff]   ;;  %v3468_v23 = vld [vmem:[%s4983_s3 + $0x140] ss:$8 sps:$4 sm:$0xff]  }
  0x85   :  { %494 = vmatprep.subr.bf16.mxu0 %v3431_v5  ;;  %535 = vmatprep.subr.bf16.mxu1 %v3453_v13  ;;  %v3445_v24 = vld [vmem:[%s4983_s3 + $0x10] ss:$8 sps:$4 sm:$0xff]   ;;  %v3471_v25 = vld [vmem:[%s4983_s3 + $0x134] ss:$8 sps:$4 sm:$0xff]   ;;  %v3446_v26 = vld [vmem:[%s4983_s3 + $0x4] ss:$8 sps:$4 sm:$0xff]  }
  0x86   :  { %v3449_v27 = vld [vmem:[%s4983_s3] ss:$8 sps:$4 sm:$0xff]   ;;  %v3474_v28 = vld [vmem:[%s4983_s3 + $0x130] ss:$8 sps:$4 sm:$0xff]   ;;  %v3477_v29 = vld [vmem:[%s4983_s3 + $0x124] ss:$8 sps:$4 sm:$0xff]  }
  0x87   :  { %v3451_v30 = vld [vmem:[%s4983_s3 + $0xf4] ss:$8 sps:$4 sm:$0xff]   ;;  %v3480_v31 = vld [vmem:[%s4983_s3 + $0x120] ss:$8 sps:$4 sm:$0xff]   ;;  %v3455_v32 = vld [vmem:[%s4983_s3 + $0xf0] ss:$8 sps:$4 sm:$0xff]  }
  0x88   :  { %495 = vmatpush1.bf16.msra.mxu0 %v3433_v6  ;;  %536 = vmatpush1.bf16.msra.mxu1 %v3456_v15  ;;  %v3483_v33 = vld [vmem:[%s4983_s3 + $0x114] ss:$8 sps:$4 sm:$0xff]   ;;  %v177_v34 = vld [vmem:[%s4984_s29 + $0x8] sm:$0xff]  ;;  %v180_v36 = vld [vmem:[%s4984_s29 + $0x20] sm:$0xff]  ;;  %v4310_v13 = vshrl.u32 %v234_v12, 7 }
  0x89   :  { %496 = vmatprep.subr.bf16.mxu0 %v3434_v7  ;;  %537 = vmatprep.subr.bf16.mxu1 %v3459_v17  ;;  %v3457_v35 = vld [vmem:[%s4983_s3 + $0xe4] ss:$8 sps:$4 sm:$0xff]   ;;  %v3461_v37 = vld [vmem:[%s4983_s3 + $0xe0] ss:$8 sps:$4 sm:$0xff]   ;;  %v3486_v38 = vld [vmem:[%s4983_s3 + $0x110] ss:$8 sps:$4 sm:$0xff]   ;;  %v183_v39 = vpack.c.bf16 %v180_v36, %v177_v34 }
  0x8a   :  { %v3463_v40 = vld [vmem:[%s4983_s3 + $0xd4] ss:$8 sps:$4 sm:$0xff]   ;;  %v3489_v41 = vld [vmem:[%s4983_s3 + $0x104] ss:$8 sps:$4 sm:$0xff]   ;;  %v3492_v42 = vld [vmem:[%s4983_s3 + $0x100] ss:$8 sps:$4 sm:$0xff]  }
  0x8b   :  { %v178_v43 = vld [vmem:[%s4984_s29 + $0x10] sm:$0xff]  ;;  %v181_v44 = vld [vmem:[%s4984_s29 + $0x28] sm:$0xff]  ;;  %522 = vmatprep.mubr.bf16.mxu0 %v183_v39  ;;  %v3496_v47 = vld [vmem:[%s4985_s20 + $0x38] sm:$0xff]   ;;  %v4313_v14 = vsub.s32 1, %v4310_v13 }
  0x8c   :  { %497 = vmatpush1.bf16.msra.mxu0 %v3436_v8  ;;  %538 = vmatpush1.bf16.msra.mxu1 %v3462_v20  ;;  %v3467_v45 = vld [vmem:[%s4983_s3 + $0xd0] ss:$8 sps:$4 sm:$0xff]   ;;  %v3469_v46 = vld [vmem:[%s4983_s3 + $0xc4] ss:$8 sps:$4 sm:$0xff]   ;;  %v3473_v48 = vld [vmem:[%s4983_s3 + $0xc0] ss:$8 sps:$4 sm:$0xff]   ;;  %v184_v49 = vpack.c.bf16 %v181_v44, %v178_v43 }
  0x8d   :  { %498 = vmatprep.subr.bf16.mxu0 %v3437_v10  ;;  %539 = vmatprep.subr.bf16.mxu1 %v3465_v21  ;;  %v3475_v50 = vld [vmem:[%s4983_s3 + $0xb4] ss:$8 sps:$4 sm:$0xff]   ;;  %v3479_v52 = vld [vmem:[%s4983_s3 + $0xb0] ss:$8 sps:$4 sm:$0xff]   ;;  %v3481_v53 = vld [vmem:[%s4983_s3 + $0xa4] ss:$8 sps:$4 sm:$0xff]  }
  0x8e   :  { %v3497_v51 = vld [vmem:[%s4985_s20 + $0x30] sm:$0xff]   ;;  %v3485_v54 = vld [vmem:[%s4983_s3 + $0xa0] ss:$8 sps:$4 sm:$0xff]   ;;  %v3493_v57 = vld [vmem:[%s4983_s3 + $0x84] ss:$8 sps:$4 sm:$0xff]  }
  0x8f   :  { %v3487_v55 = vld [vmem:[%s4983_s3 + $0x94] ss:$8 sps:$4 sm:$0xff]   ;;  %v3491_v56 = vld [vmem:[%s4983_s3 + $0x90] ss:$8 sps:$4 sm:$0xff]   ;;  %v3495_v58 = vld [vmem:[%s4983_s3 + $0x80] ss:$8 sps:$4 sm:$0xff]  }
  0x90   :  { %499 = vmatpush1.bf16.msra.mxu0 %v3439_v16  ;;  %540 = vmatpush1.bf16.msra.mxu1 %v3468_v23  ;;  %v176_v59 = vld [vmem:[%s4984_s29] sm:$0xff]  ;;  %v179_v60 = vld [vmem:[%s4984_s29 + $0x18] sm:$0xff]  ;;  %v3498_v62 = vld [vmem:[%s4985_s20 + $0x28] sm:$0xff]   ;;  %v4316_v16 = vsub.s32 0, %v4310_v13 }
  0x91   :  { %500 = vmatprep.subr.bf16.mxu0 %v3440_v18  ;;  %541 = vmatprep.subr.bf16.mxu1 %v3471_v25  ;;  %v182_v61 = vpack.c.bf16 %v179_v60, %v176_v59  ;;  %v3499_v63 = vld [vmem:[%s4985_s20 + $0x20] sm:$0xff]   ;;  %v3500_v1 = vld [vmem:[%s4985_s20 + $0x18] sm:$0xff]   ;;  %v3501_v2 = vld [vmem:[%s4985_s20 + $0x10] sm:$0xff]  }
  0x92   :  { %v3502_v3 = vld [vmem:[%s4985_s20 + $0x8] sm:$0xff]   ;;  %v3503_v4 = vld [vmem:[%s4985_s20] sm:$0xff]   ;;  %v3506_v8 = vld [vmem:[%s4986_s9 + $0x30] ss:$8 sps:$4 sm:$0xff]  }
  0x93   :  { %v3504_v5 = vld [vmem:[%s4985_s20 + $0x48] sm:$0x1f]   ;;  %v3505_v7 = vld [vmem:[%s4985_s20 + $0x40] sm:$0xff]   ;;  %v3508_v9 = vld [vmem:[%s4986_s9 + $0x34] ss:$8 sps:$4 sm:$0xff]  }
  0x94   :  { %501 = vmatpush1.bf16.msra.mxu0 %v3442_v19  ;;  %542 = vmatpush1.bf16.msra.mxu1 %v3474_v28  ;;  %v674_v6 = vsel %vm672_vm2, %v3504_v5, 0  ;;  %v3511_v10 = vld [vmem:[%s4986_s9 + $0x24] ss:$8 sps:$4 sm:$0xff]   ;;  %v3509_v11 = vld [vmem:[%s4986_s9 + $0x20] ss:$8 sps:$4 sm:$0xff]  }
  0x95   :  { %502 = vmatprep.subr.bf16.mxu0 %v3443_v22  ;;  %543 = vmatprep.subr.bf16.mxu1 %v3477_v29  ;;  %v232_v17 = vld [vmem:[#allocation5] sm:$0x3]  ;;  %v3515_v44 = vld [vmem:[%s4986_s9] ss:$8 sps:$4 sm:$0xff]   ;;  %v3521_v60 = vld [vmem:[%s4955_s8 + $0xb0] ss:$12 sps:$4 sm:$0xff]  }
  0x96   :  { %v241_v18 = vrot.slane %v232_v17, %v4313_v14  ;;  %v237_v20 = vrot.slane %v232_v17, %v4316_v16  ;;  %v3517_v43 = vld [vmem:[%s4986_s9 + $0x4] ss:$8 sps:$4 sm:$0xff]   ;;  %v3540_v5 = vld [vmem:[%s4955_s8 + $0x34] ss:$12 sps:$4 sm:$0xff]  }
  0x97   :  { %v3548_v12 = vld [vmem:[%s4955_s8 + $0x4] ss:$12 sps:$4 sm:$0xff]   ;;  %v3550_v17 = vld [vmem:[%s4955_s8 + $0xdc] ss:$12 sps:$4 sm:$0x1f]  }
  0x98   :  { %503 = vmatpush1.bf16.msra.mxu0 %v3445_v24  ;;  %544 = vmatpush1.bf16.msra.mxu1 %v3480_v31 }
  0x99   :  { %504 = vmatprep.subr.bf16.mxu0 %v3446_v26  ;;  %545 = vmatprep.subr.bf16.mxu1 %v3483_v33 }
  0x9c   :  { %505 = vmatpush1.bf16.msra.mxu0 %v3449_v27  ;;  %546 = vmatpush1.bf16.msra.mxu1 %v3486_v38 }
  0x9d   :  { %506 = vmatprep.subr.bf16.mxu0 %v3451_v30  ;;  %547 = vmatprep.subr.bf16.mxu1 %v3489_v41  ;;  %v3514_v41 = vld [vmem:[%s4986_s9 + $0x14] ss:$8 sps:$4 sm:$0xff]  }
  0xa0   :  { %507 = vmatpush2.bf16.msra.mxu0 %v3455_v32  ;;  %548 = vmatpush1.bf16.msra.mxu1 %v3492_v42  ;;  %v3512_v42 = vld [vmem:[%s4986_s9 + $0x10] ss:$8 sps:$4 sm:$0xff]  }
  0xa1   :  { %508 = vmatprep.subr.bf16.mxu0 %v3457_v35  ;;  %676 = vmatprep.subr.bf16.mxu1 %v3946_v0 }
  0xa3   :  { %2994 = vmatmul.mubr.msk.bf16.vlgmr.msra.gmra.mxu1 %vm479_vm1, %v184_v49  ;;  %v3528_v49 = vld [vmem:[%s4955_s8 + $0x7c] ss:$12 sps:$4 sm:$0xff]  }
  0xa4   :  { %509 = vmatpush2.bf16.msra.mxu0 %v3461_v37  ;;  %677 = vmatpush1.bf16.msra.mxu1 %v3496_v47  ;;  %v3524_v47 = vld [vmem:[%s4955_s8 + $0x94] ss:$12 sps:$4 sm:$0xff]  }
  0xa5   :  { %510 = vmatprep.subr.bf16.mxu0 %v3463_v40  ;;  %678 = vmatprep.subr.bf16.mxu1 %v3946_v0 }
  0xa8   :  { %511 = vmatpush2.bf16.msra.mxu0 %v3467_v45  ;;  %679 = vmatpush1.bf16.msra.mxu1 %v3497_v51  ;;  %v3518_v45 = vld [vmem:[%s4955_s8 + $0xa8] ss:$12 sps:$4 sm:$0xff]   ;;  %v3532_v51 = vld [vmem:[%s4955_s8 + $0x64] ss:$12 sps:$4 sm:$0xff]  }
  0xa9   :  { %512 = vmatprep.subr.bf16.mxu0 %v3469_v46  ;;  %680 = vmatprep.subr.bf16.mxu1 %v3946_v0  ;;  %v3520_v46 = vld [vmem:[%s4955_s8 + $0xac] ss:$12 sps:$4 sm:$0xff]  }
  0xac   :  { %513 = vmatpush2.bf16.msra.mxu0 %v3473_v48  ;;  %681 = vmatpush1.bf16.msra.mxu1 %v3498_v62  ;;  %v3522_v48 = vld [vmem:[%s4955_s8 + $0x90] ss:$12 sps:$4 sm:$0xff]   ;;  %v3525_v62 = vld [vmem:[%s4955_s8 + $0x98] ss:$12 sps:$4 sm:$0xff]  }
  0xad   :  { %514 = vmatprep.subr.bf16.mxu0 %v3475_v50  ;;  %682 = vmatprep.subr.bf16.mxu1 %v3946_v0  ;;  %v3526_v50 = vld [vmem:[%s4955_s8 + $0x78] ss:$12 sps:$4 sm:$0xff]  }
  0xb0   :  { %515 = vmatpush2.bf16.msra.mxu0 %v3479_v52  ;;  %683 = vmatpush1.bf16.msra.mxu1 %v3499_v63  ;;  %v3530_v52 = vld [vmem:[%s4955_s8 + $0x60] ss:$12 sps:$4 sm:$0xff]  }
  0xb1   :  { %516 = vmatprep.subr.bf16.mxu0 %v3481_v53  ;;  %684 = vmatprep.subr.bf16.mxu1 %v3946_v0  ;;  %v3529_v63 = vld [vmem:[%s4955_s8 + $0x80] ss:$12 sps:$4 sm:$0xff]  }
  0xb4   :  { %517 = vmatpush2.bf16.msra.mxu0 %v3485_v54  ;;  %685 = vmatpush1.bf16.msra.mxu1 %v3500_v1  ;;  %v2995_v54 = vld [vmem:[%s4987_s26] ss:$0 sm:$0xff]  ;;  %v3533_v1 = vld [vmem:[%s4955_s8 + $0x68] ss:$12 sps:$4 sm:$0xff]  }
  0xb5   :  { %518 = vmatprep.subr.bf16.mxu0 %v3487_v55  ;;  %686 = vmatprep.subr.bf16.mxu1 %v3946_v0 }
  0xb8   :  { %519 = vmatpush2.bf16.msra.mxu0 %v3491_v56  ;;  %687 = vmatpush1.bf16.msra.mxu1 %v3501_v2  ;;  %v3536_v2 = vld [vmem:[%s4955_s8 + $0x4c] ss:$12 sps:$4 sm:$0xff]  }
  0xb9   :  { %520 = vmatprep.subr.bf16.mxu0 %v3493_v57  ;;  %688 = vmatprep.subr.bf16.mxu1 %v3946_v0 }
  0xbc   :  { %521 = vmatpush2.bf16.msra.mxu0 %v3495_v58  ;;  %689 = vmatpush1.bf16.msra.mxu1 %v3502_v3  ;;  %v3534_v3 = vld [vmem:[%s4955_s8 + $0x48] ss:$12 sps:$4 sm:$0xff]  }
  0xbd   :  { %690 = vmatprep.subr.bf16.mxu1 %v3946_v0  ;;  %790 = vmatprep.subr.bf16.mxu0 %v3508_v9  ;;  %v3542_v9 = vld [vmem:[%s4955_s8 + $0x18] ss:$12 sps:$4 sm:$0xff]  }
  0xbf   :  { %523 = vmatmul.mubr.bf16.vlgmr.msra.gmra.mxu0 %v182_v61 }
  0xc0   :  { %814 = vmatprep.mubr.bf16.mxu0 %v3946_v0  ;;  %691 = vmatpush1.bf16.msra.mxu1 %v3503_v4  ;;  %v3537_v4 = vld [vmem:[%s4955_s8 + $0x50] ss:$12 sps:$4 sm:$0xff]  }
  0xc1   :  { %704 = vmatprep.subr.bf16.mxu1 %v3946_v0  ;;  %791 = vmatpush1.bf16.msra.mxu0 %v3506_v8  ;;  %v3544_v8 = vld [vmem:[%s4955_s8 + $0x1c] ss:$12 sps:$4 sm:$0xff]  }
  0xc2   :  { %792 = vmatprep.subr.bf16.mxu0 %v3511_v10  ;;  %v3545_v10 = vld [vmem:[%s4955_s8 + $0x20] ss:$12 sps:$4 sm:$0xff]  }
  0xc4   :  { %705 = vmatpush2.bf16.msra.mxu1 %v674_v6  ;;  %v3538_v6 = vld [vmem:[%s4955_s8 + $0x30] ss:$12 sps:$4 sm:$0xff]  }
  0xc5   :  { %706 = vmatprep.subr.bf16.mxu1 %v3946_v0  ;;  %793 = vmatpush1.bf16.msra.mxu0 %v3509_v11  ;;  %v3546_v11 = vld [vmem:[%s4955_s8] ss:$12 sps:$4 sm:$0xff]  }
  0xc6   :  { %794 = vmatprep.subr.bf16.mxu0 %v3514_v41 }
  0xc8   :  { %707 = vmatpush2.bf16.msra.mxu1 %v3505_v7  ;;  %v3541_v7 = vld [vmem:[%s4955_s8 + $0x38] ss:$12 sps:$4 sm:$0xff]  }
  0xc9   :  { %795 = vmatpush1.bf16.msra.mxu0 %v3512_v42  ;;  %1057 = vmatprep.subr.bf16.mxu1 %v3520_v46  ;;  %v3564_v46 = vld [vmem:[%s4957_s10 + $0x34] ss:$12 sps:$4 sm:$0xff]  }
  0xca   :  { %796 = vmatprep.subr.bf16.mxu0 %v3517_v43  ;;  %v3558_v43 = vld [vmem:[%s4957_s10 + $0x48] ss:$12 sps:$4 sm:$0xff]  }
  0xcd   :  { %797 = vmatpush1.bf16.msra.mxu0 %v3515_v44  ;;  %v3561_v44 = vld [vmem:[%s4957_s10 + $0x50] ss:$12 sps:$4 sm:$0xff]  }
  0xce   :  { %1100 = vmatprep.subr.bf16.mxu0 %v3946_v0 }
 0x163   :  { %v567_v15 = vpop.f32.mrf.mxu1 }
 0x165   :  { %v569_v19 = vpop.f32.mrf.mxu1 }
 0x167   :  { %v571_v25 = vpop.f32.mrf.mxu1 }
 0x169   :  { %v573_v33 = vpop.f32.mrf.mxu1 }
 0x17f   :  { %v524_v21 = vpop.f32.mrf.mxu0 }
 0x180   :  { %v525_v24 = vadd.f32 %v524_v21, %v237_v20 }
 0x181   :  { %v526_v22 = vpop.f32.mrf.mxu0 }
 0x182   :  { %v527_v23 = vadd.f32 %v526_v22, %v241_v18  ;;  %v568_v32 = vadd.f32 %v567_v15, %v525_v24  ;;  %v3549_v15 = vld [vmem:[%s4955_s8 + $0x8] ss:$12 sps:$4 sm:$0xff]   ;;  %v3556_v22 = vld [vmem:[%s4955_s8 + $0xc4] ss:$12 sps:$4 sm:$0xff]  }
 0x183   :  { %v528_v26 = vpop.f32.mrf.mxu0  ;;  %v3557_v24 = vld [vmem:[%s4955_s8 + $0xc8] ss:$12 sps:$4 sm:$0xff]  }
 0x184   :  { %v570_v27 = vadd.f32 %v569_v19, %v527_v23  ;;  %v529_v28 = vadd.f32 %v528_v26, %v237_v20  ;;  %v3553_v19 = vld [vmem:[%s4955_s8 + $0xe0] ss:$12 sps:$4 sm:$0x1f]   ;;  %v3947_v26 = vmov 0.0  }
 0x185   :  { %v530_v29 = vpop.f32.mrf.mxu0  ;;  %v1055_v21 = vsel %vm672_vm2, %v3553_v19, 0  ;;  %v3554_v23 = vld [vmem:[%s4955_s8 + $0xc0] ss:$12 sps:$4 sm:$0xff]  }
 0x186   :  { %v572_v30 = vadd.f32 %v571_v25, %v529_v28  ;;  %v531_v31 = vadd.f32 %v530_v29, %v241_v18  ;;  %3629 = vtanh.f32 %v570_v27  ;;  %v3552_v18 = vld [vmem:[%s4955_s8 + $0xd8] ss:$12 sps:$4 sm:$0x1f]   ;;  %v726_v27 = vld [vmem:[#allocation7] sm:$0x3] }
 0x187   :  { %v1049_v20 = vsel %vm672_vm2, %v3552_v18, 0  ;;  %v3560_v25 = vld [vmem:[%s4957_s10 + $0x4c] ss:$12 sps:$4 sm:$0xff]   ;;  %v735_v28 = vrot.slane %v726_v27, %v4313_v14 }
 0x188   :  { %v574_v34 = vadd.f32 %v573_v33, %v531_v31  ;;  %3631 = vtanh.f32 %v572_v30  ;;  %v731_v30 = vrot.slane %v726_v27, %v4316_v16  ;;  %v1163_v27 = vld [vmem:[#allocation10] sm:$0x7] }
 0x18a   :  { %3633 = vtanh.f32 %v574_v34 }
 0x18b   :  { %3635 = vtanh.f32 %v568_v32 }
 0x193   :  { %v3630_v35 = vpop.eup %3629 }
 0x195   :  { %v3632_v36 = vpop.eup %3631 }
 0x197   :  { %v3634_v37 = vpop.eup %3633 }
 0x198   :  { %v3636_v38 = vpop.eup %3635  ;;  %v581_v39 = vpack.c.bf16 %v3634_v37, %v3630_v35 }
 0x199   :  { %v580_v40 = vpack.c.bf16 %v3632_v36, %v3636_v38 }
 0x19a   :  { %3006 = vmatprep.mubr.msk.bf16.mxu1 %vm668_vm3, %v581_v39 }
 0x19b   :  { %709 = vmatmul.mubr.bf16.vlgmr.msra.gmra.mxu1 %v580_v40 }
 0x19c   :  { %1058 = vmatpush1.bf16.msra.mxu1 %v3518_v45 }
 0x19d   :  { %1059 = vmatprep.subr.bf16.mxu1 %v3524_v47  ;;  %v3562_v47 = vld [vmem:[%s4957_s10 + $0x30] ss:$12 sps:$4 sm:$0xff]  }
 0x1a0   :  { %1060 = vmatpush1.bf16.msra.mxu1 %v3522_v48  ;;  %v3565_v48 = vld [vmem:[%s4957_s10 + $0x38] ss:$12 sps:$4 sm:$0xff]  }
 0x1a1   :  { %1061 = vmatprep.subr.bf16.mxu1 %v3528_v49  ;;  %v3568_v49 = vld [vmem:[%s4957_s10 + $0x1c] ss:$12 sps:$4 sm:$0xff]  }
 0x1a4   :  { %1062 = vmatpush1.bf16.msra.mxu1 %v3526_v50  ;;  %v3566_v50 = vld [vmem:[%s4957_s10 + $0x18] ss:$12 sps:$4 sm:$0xff]  }
 0x1a5   :  { %1063 = vmatprep.subr.bf16.mxu1 %v3532_v51  ;;  %v3569_v51 = vld [vmem:[%s4957_s10 + $0x20] ss:$12 sps:$4 sm:$0xff]  }
 0x1a8   :  { %1064 = vmatpush1.bf16.msra.mxu1 %v3530_v52  ;;  %v3572_v52 = vld [vmem:[%s4957_s10 + $0x4] ss:$12 sps:$4 sm:$0xff]  }
 0x1a9   :  { %1065 = vmatprep.subr.bf16.mxu1 %v3536_v2  ;;  %v4561_v2 = vld [vmem:[%s4959_s12] ss:$12 sps:$4 sm:$0xff]  }
 0x1ac   :  { %1066 = vmatpush1.bf16.msra.mxu1 %v3534_v3  ;;  %v4568_v3 = vld [vmem:[%s4959_s12 + $0x8] ss:$12 sps:$4 sm:$0xff]  }
 0x1ad   :  { %1067 = vmatprep.subr.bf16.mxu1 %v3540_v5  ;;  %v871_v5 = vld [vmem:[#allocation8] sm:$0x7] }
 0x1b0   :  { %1068 = vmatpush1.bf16.msra.mxu1 %v3538_v6  ;;  %v876_v6 = vrot.slane %v871_v5, %v4316_v16 }
 0x1b1   :  { %1069 = vmatprep.subr.bf16.mxu1 %v3544_v8  ;;  %v880_v8 = vrot.slane %v871_v5, %v4313_v14 }
 0x1b4   :  { %1070 = vmatpush1.bf16.msra.mxu1 %v3542_v9 }
 0x1b5   :  { %1071 = vmatprep.subr.bf16.mxu1 %v3548_v12 }
 0x1b8   :  { %1072 = vmatpush1.bf16.msra.mxu1 %v3546_v11 }
 0x1b9   :  { %3046 = vmatprep.subr.msk.bf16.mxu1 %vm672_vm2, %v3550_v17 }
 0x1bc   :  { %1086 = vmatpush2.bf16.msra.mxu1 %v1049_v20 }
 0x1bd   :  { %1087 = vmatprep.subr.bf16.mxu1 %v3556_v22 }
 0x1c0   :  { %1088 = vmatpush2.bf16.msra.mxu1 %v3554_v23 }
 0x1c1   :  { %1252 = vmatprep.subr.bf16.mxu1 %v3560_v25 }
 0x25b   :  { %v710_v53 = vpop.f32.mrf.mxu1 }
 0x25c   :  { %v711_v57 = vadd.f32 %v2995_v54, %v710_v53  ;;  %v3570_v53 = vld [vmem:[%s4957_s10] ss:$12 sps:$4 sm:$0xff]  }
 0x25d   :  { %v712_v55 = vpop.f32.mrf.mxu1 }
 0x25e   :  { %v4493_v55 = vld [vmem:[%s4959_s12 + $0x4c] ss:$12 sps:$4 sm:$0xff]  }
 0x25f   :  { %v713_v56 = vpop.f32.mrf.mxu1 }
 0x260   :  { %v714_v58 = vadd.f32 %v2995_v54, %v713_v56  ;;  %v3573_v54 = vld [vmem:[%s4957_s10 + $0x8] ss:$12 sps:$4 sm:$0xff]  }
 0x261   :  { %v715_v59 = vpop.f32.mrf.mxu1  ;;  %v4498_v56 = vld [vmem:[%s4959_s12 + $0x48] ss:$12 sps:$4 sm:$0xff]  }
 0x262   :  { %v4364_v61 = vpack.c.bf16 %v714_v58, %v711_v57  ;;  %v4504_v57 = vld [vmem:[%s4959_s12 + $0x34] ss:$12 sps:$4 sm:$0xff]   ;;  %v4510_v58 = vld [vmem:[%s4959_s12 + $0x50] ss:$12 sps:$4 sm:$0xff]  }
 0x263   :  { %v4520_v59 = vld [vmem:[%s4959_s12 + $0x30] ss:$12 sps:$4 sm:$0xff]  }
 0x264   :  { %3015 = vmatmul.mubr.msk.bf16.vlgmr.msra.gmra.mxu0 %vm778_vm4, %v4364_v61 }
 0x265   :  { %1101 = vmatpush1.bf16.msra.mxu0 %v3521_v60  ;;  %v4527_v60 = vld [vmem:[%s4959_s12 + $0x1c] ss:$12 sps:$4 sm:$0xff]  }
 0x266   :  { %1102 = vmatprep.subr.bf16.mxu0 %v3946_v0 }
 0x269   :  { %1103 = vmatpush1.bf16.msra.mxu0 %v3525_v62  ;;  %v4542_v62 = vld [vmem:[%s4959_s12 + $0x18] ss:$12 sps:$4 sm:$0xff]  }
 0x26a   :  { %1104 = vmatprep.subr.bf16.mxu0 %v3946_v0 }
 0x26d   :  { %1105 = vmatpush1.bf16.msra.mxu0 %v3529_v63  ;;  %v4548_v63 = vld [vmem:[%s4959_s12 + $0x4] ss:$12 sps:$4 sm:$0xff]  }
 0x26e   :  { %1106 = vmatprep.subr.bf16.mxu0 %v3946_v0 }
 0x271   :  { %1107 = vmatpush1.bf16.msra.mxu0 %v3533_v1  ;;  %v4554_v1 = vld [vmem:[%s4959_s12 + $0x20] ss:$12 sps:$4 sm:$0xff]  }
 0x272   :  { %1108 = vmatprep.subr.bf16.mxu0 %v3946_v0 }
 0x275   :  { %1109 = vmatpush1.bf16.msra.mxu0 %v3537_v4  ;;  %v883_v4 = vsub.s32 2, %v4310_v13 }
 0x276   :  { %1110 = vmatprep.subr.bf16.mxu0 %v3946_v0 }
 0x279   :  { %1111 = vmatpush1.bf16.msra.mxu0 %v3541_v7  ;;  %v884_v7 = vrot.slane %v871_v5, %v883_v4 }
 0x27a   :  { %1112 = vmatprep.subr.bf16.mxu0 %v3946_v0 }
 0x27d   :  { %1113 = vmatpush1.bf16.msra.mxu0 %v3545_v10 }
 0x27e   :  { %1114 = vmatprep.subr.bf16.mxu0 %v3946_v0 }
 0x281   :  { %1115 = vmatpush1.bf16.msra.mxu0 %v3549_v15 }
 0x282   :  { %1128 = vmatprep.subr.bf16.mxu0 %v3946_v0 }
 0x285   :  { %1129 = vmatpush2.bf16.msra.mxu0 %v1055_v21 }
 0x286   :  { %1130 = vmatprep.subr.bf16.mxu0 %v3946_v0 }
 0x289   :  { %1131 = vmatpush2.bf16.msra.mxu0 %v3557_v24 }
 0x28a   :  { %3243 = vmatprep.subr.bf16.mxu0 %v3947_v26 }
 0x324   :  { %v816_v29 = vpop.f32.mrf.mxu0 }
 0x325   :  { %v817_v35 = vadd.f32 %v816_v29, %v731_v30 }
 0x326   :  { %v818_v31 = vpop.f32.mrf.mxu0 }
 0x327   :  { %v819_v32 = vadd.f32 %v818_v31, %v735_v28 }
 0x328   :  { %v820_v33 = vpop.f32.mrf.mxu0 }
 0x329   :  { %v821_v34 = vadd.f32 %v820_v33, %v731_v30  ;;  %3637 = vtanh.f32 %v819_v32  ;;  %v1168_v32 = vrot.slane %v1163_v27, %v4316_v16  ;;  %v1176_v33 = vrot.slane %v1163_v27, %v883_v4 }
 0x32a   :  { %v822_v36 = vpop.f32.mrf.mxu0 }
 0x32b   :  { %v823_v37 = vadd.f32 %v822_v36, %v735_v28  ;;  %3639 = vtanh.f32 %v821_v34  ;;  %v1172_v36 = vrot.slane %v1163_v27, %v4313_v14 }
 0x32d   :  { %3641 = vtanh.f32 %v823_v37 }
 0x32e   :  { %3643 = vtanh.f32 %v817_v35 }
 0x336   :  { %v3638_v38 = vpop.eup %3637 }
 0x338   :  { %v3640_v39 = vpop.eup %3639 }
 0x33a   :  { %v3642_v40 = vpop.eup %3641 }
 0x33b   :  { %v3644_v41 = vpop.eup %3643  ;;  %v830_v42 = vpack.c.bf16 %v3642_v40, %v3638_v38 }
 0x33c   :  { %v829_v45 = vpack.c.bf16 %v3640_v39, %v3644_v41 }
 0x33d   :  { %3047 = vmatprep.mubr.msk.bf16.mxu1 %vm668_vm3, %v830_v42  ;;  %3048 = vmatprep.mubr.msk.bf16.mxu0 %vm668_vm3, %v830_v42 }
 0x33e   :  { %1090 = vmatmul.mubr.bf16.vlgmr.msra.gmra.mxu1 %v829_v45  ;;  %1133 = vmatmul.mubr.bf16.vlgmr.msra.gmra.mxu0 %v829_v45 }
 0x33f   :  { %1253 = vmatpush1.bf16.msra.mxu1 %v3558_v43  ;;  %3244 = vmatpush3.bf16.msra.mxu0 %v3561_v44 }
 0x340   :  { %1254 = vmatprep.subr.bf16.mxu1 %v3564_v46  ;;  %3245 = vmatprep.subr.bf16.mxu0 %v3947_v26 }
 0x341   :  { %1276 = vmatprep.mubr.bf16.mxu1 %v3946_v0  ;;  %3251 = vmatprep.mubr.msk.bf16.mxu0 %vm3948_vm5, %v3947_v26 }
 0x343   :  { %1255 = vmatpush1.bf16.msra.mxu1 %v3562_v47  ;;  %3246 = vmatpush3.bf16.msra.mxu0 %v3565_v48 }
 0x344   :  { %1256 = vmatprep.subr.bf16.mxu1 %v3568_v49  ;;  %3247 = vmatprep.subr.bf16.mxu0 %v3947_v26 }
 0x347   :  { %1257 = vmatpush1.bf16.msra.mxu1 %v3566_v50  ;;  %3248 = vmatpush3.bf16.msra.mxu0 %v3569_v51 }
 0x348   :  { %1258 = vmatprep.subr.bf16.mxu1 %v3572_v52  ;;  %3249 = vmatprep.subr.bf16.mxu0 %v3947_v26 }
 0x34b   :  { %1259 = vmatpush1.bf16.msra.mxu1 %v3570_v53  ;;  %3250 = vmatpush3.bf16.msra.mxu0 %v3573_v54 }
 0x34c   :  { %1426 = vmatprep.subr.bf16.mxu1 %v4493_v55  ;;  %3255 = vmatprep.subr.bf16.mxu0 %v3947_v26 }
 0x34e   :  { %3061 = vmatmul.mubr.msk.bf16.vlgmr.msra.gmra.mxu1 %vm778_vm4, %v4364_v61  ;;  %3252 = vmatmul.mubr.msk.bf16.vlgmr.msra.gmra.mxu0 %vm778_vm4, %v4364_v61  ;;  %v4533_v61 = vld [vmem:[%s4959_s12 + $0x38] ss:$12 sps:$4 sm:$0xff]  }
 0x34f   :  { %1427 = vmatpush1.bf16.msra.mxu1 %v4498_v56  ;;  %1450 = vmatprep.mubr.bf16.mxu1 %v3946_v0 }
 0x350   :  { %1428 = vmatprep.subr.bf16.mxu1 %v4504_v57  ;;  %3256 = vmatpush3.bf16.msra.mxu0 %v4510_v58 }
 0x351   :  { %3257 = vmatprep.subr.bf16.mxu0 %v3947_v26  ;;  %3263 = vmatprep.mubr.msk.bf16.mxu0 %vm3948_vm5, %v3947_v26 }
 0x353   :  { %1429 = vmatpush1.bf16.msra.mxu1 %v4520_v59 }
 0x354   :  { %1430 = vmatprep.subr.bf16.mxu1 %v4527_v60  ;;  %3258 = vmatpush3.bf16.msra.mxu0 %v4533_v61 }
 0x355   :  { %3259 = vmatprep.subr.bf16.mxu0 %v3947_v26 }
 0x357   :  { %1431 = vmatpush1.bf16.msra.mxu1 %v4542_v62 }
 0x358   :  { %1432 = vmatprep.subr.bf16.mxu1 %v4548_v63  ;;  %3260 = vmatpush3.bf16.msra.mxu0 %v4554_v1 }
 0x359   :  { %3261 = vmatprep.subr.bf16.mxu0 %v3947_v26 }
 0x35b   :  { %1433 = vmatpush1.bf16.msra.mxu1 %v4561_v2 }
 0x35c   :  { %3262 = vmatpush3.bf16.msra.mxu0 %v4568_v3  ;;  %1533 = vmatprep.subr.bf16.mxu1 %v4493_v55 }
 0x35d   :  { %3267 = vmatprep.subr.bf16.mxu0 %v3947_v26 }
 0x35e   :  { %1451 = vmatmul.mubr.bf16.vlgmr.msra.gmra.mxu1 %v3946_v0 }
 0x35f   :  { %3264 = vmatmul.mubr.bf16.vlgmr.msra.gmra.mxu0 %v3946_v0  ;;  %1534 = vmatpush1.bf16.msra.mxu1 %v4498_v56 }
 0x360   :  { %3268 = vmatpush3.bf16.msra.mxu0 %v4510_v58  ;;  %1535 = vmatprep.subr.bf16.mxu1 %v4504_v57 }
 0x361   :  { %3269 = vmatprep.subr.bf16.mxu0 %v3947_v26  ;;  %1557 = vmatprep.mubr.bf16.mxu1 %v3946_v0 }
 0x362   :  { %3275 = vmatprep.mubr.msk.bf16.mxu0 %vm3948_vm5, %v3947_v26 }
 0x363   :  { %1536 = vmatpush1.bf16.msra.mxu1 %v4520_v59 }
 0x364   :  { %3270 = vmatpush3.bf16.msra.mxu0 %v4533_v61  ;;  %1537 = vmatprep.subr.bf16.mxu1 %v4527_v60 }
 0x365   :  { %3271 = vmatprep.subr.bf16.mxu0 %v3947_v26 }
 0x367   :  { %1538 = vmatpush1.bf16.msra.mxu1 %v4542_v62 }
 0x368   :  { %3272 = vmatpush3.bf16.msra.mxu0 %v4554_v1  ;;  %1539 = vmatprep.subr.bf16.mxu1 %v4548_v63 }
 0x369   :  { %3273 = vmatprep.subr.bf16.mxu0 %v3947_v26 }
 0x36b   :  { %1540 = vmatpush1.bf16.msra.mxu1 %v4561_v2 }
 0x36c   :  { %3274 = vmatpush3.bf16.msra.mxu0 %v4568_v3  ;;  %1654 = vmatprep.subr.bf16.mxu1 %v4493_v55 }
 0x36d   :  { %3279 = vmatprep.subr.bf16.mxu0 %v3947_v26 }
 0x3fe   :  { %v1091_v9 = vpop.f32.mrf.mxu1  ;;  %v1134_v10 = vpop.f32.mrf.mxu0 }
 0x3ff   :  { %v1092_v11 = vadd.f32 %v1091_v9, %v876_v6  ;;  %v1135_v12 = vadd.f32 %v1134_v10, %v884_v7 }
 0x400   :  { %v1093_v15 = vpop.f32.mrf.mxu1  ;;  %v1136_v17 = vpop.f32.mrf.mxu0 }
 0x401   :  { %1141 = vst [vmem:[%s4968_s21] sm:$0xff] %v1092_v11  ;;  %1143 = vst [vmem:[%s4968_s21 + $0x10] sm:$0xff] %v1135_v12  ;;  %v1094_v18 = vadd.f32 %v1093_v15, %v880_v8 }
 0x402   :  { %v1095_v19 = vpop.f32.mrf.mxu1  ;;  %v1137_v20 = vpop.f32.mrf.mxu0 }
 0x403   :  { %1142 = vst [vmem:[%s4968_s21 + $0x8] sm:$0xff] %v1094_v18  ;;  %v1096_v21 = vadd.f32 %v1095_v19, %v876_v6  ;;  %v1138_v22 = vadd.f32 %v1137_v20, %v884_v7  ;;  %v4631_v6 = vld [vmem:[#allocation11] ss:$0 sm:$0xff] }
 0x404   :  { %v1097_v23 = vpop.f32.mrf.mxu1  ;;  %v1139_v24 = vpop.f32.mrf.mxu0 }
 0x405   :  { %1144 = vst [vmem:[%s4968_s21 + $0x18] sm:$0xff] %v1096_v21  ;;  %1146 = vst [vmem:[%s4968_s21 + $0x28] sm:$0xff] %v1138_v22  ;;  %v1098_v25 = vadd.f32 %v1097_v23, %v880_v8 }
 0x407   :  { %1145 = vst [vmem:[%s4968_s21 + $0x20] sm:$0xff] %v1098_v25 }
 0x40e   :  { %v1278_v28 = vpop.f32.mrf.mxu1  ;;  %v1321_v29 = vpop.f32.mrf.mxu0 }
 0x40f   :  { %v4625_v42 = vadd.f32 %v1278_v28, %v1168_v32  ;;  %v4634_v10 = vadd.f32 %v1321_v29, %v1176_v33 }
 0x410   :  { %v1280_v30 = vpop.f32.mrf.mxu1  ;;  %v3253_v31 = vpop.f32.mrf.mxu0 }
 0x411   :  { %v4628_v49 = vadd.f32 %v1280_v30, %v1172_v36 }
 0x412   :  { %v1282_v34 = vpop.f32.mrf.mxu1  ;;  %v1324_v35 = vpop.f32.mrf.mxu0 }
 0x413   :  { %v4619_v37 = vadd.f32 %v1282_v34, %v1168_v32  ;;  %v4621_v38 = vadd.f32 %v1324_v35, %v1176_v33 }
 0x414   :  { %v1284_v39 = vpop.f32.mrf.mxu1  ;;  %v3254_v40 = vpop.f32.mrf.mxu0 }
 0x415   :  { %v4623_v41 = vadd.f32 %v1284_v39, %v1172_v36 }
 0x41e   :  { %v1452_v43 = vpop.f32.mrf.mxu1 }
 0x41f   :  { %v1499_v44 = vadd.f32 %v1452_v43, %v4625_v42  ;;  %v1493_v45 = vpop.f32.mrf.mxu0 }
 0x420   :  { %v1454_v16 = vpop.f32.mrf.mxu1  ;;  %v1513_v8 = vadd.f32 %v4631_v6, %v1493_v45 }
 0x421   :  { %v3076_v46 = vmul.f32 -1.442695, %v1499_v44  ;;  %v3265_v47 = vpop.f32.mrf.mxu0  ;;  %v1506_v51 = vadd.f32 %v1454_v16, %v4628_v49 }
 0x422   :  { %v1456_v48 = vpop.f32.mrf.mxu1 }
 0x423   :  { %3645 = vpow2.f32 %v3076_v46  ;;  %v1496_v14 = vpop.f32.mrf.mxu0  ;;  %v3077_v53 = vmul.f32 -1.442695, %v1506_v51 }
 0x424   :  { %v1457_v50 = vpop.f32.mrf.mxu1 }
 0x425   :  { %v3266_v52 = vpop.f32.mrf.mxu0  ;;  %3647 = vpow2.f32 %v3077_v53 }
 0x430   :  { %v3646_v54 = vpop.eup %3645 }
 0x431   :  { %v1503_v4 = vadd.f32 1.0, %v3646_v54 }
 0x432   :  { %v3648_v5 = vpop.eup %3647 }
 0x433   :  { %3649 = vrcp.f32 %v1503_v4  ;;  %v1510_v7 = vadd.f32 1.0, %v3648_v5 }
 0x435   :  { %3651 = vrcp.f32 %v1510_v7 }
 0x440   :  { %v3650_v9 = vpop.eup %3649 }
 0x441   :  { %v1514_v11 = vmul.f32 %v3650_v9, %v1513_v8 }
 0x442   :  { %v3652_v15 = vpop.eup %3651 }
 0x443   :  { %v1515_v12 = vadd.f32 %v1514_v11, %v4634_v10  ;;  %v1517_v17 = vsub.f32 1.0, %v3652_v15  ;;  %v1519_v20 = vmul.f32 0.0, %v3652_v15 }
 0x445   :  { %3653 = vtanh.f32 %v1515_v12 }
 0x452   :  { %v3654_v18 = vpop.eup %3653 }
 0x453   :  { %v1518_v19 = vmul.f32 %v3654_v18, %v1517_v17 }
 0x455   :  { %v1520_v21 = vadd.f32 %v1519_v20, %v1518_v19 }
 0x457   :  { %v1521_v22 = vpack.c.bf16 %v1520_v21, %v1520_v21  ;;  %v1636_v51 = vrot.slane %v1520_v21, 6 }
 0x459   :  { %3078 = vmatmul.mubr.msk.bf16.vlgmr.msra.gmra.mxu1 %vm778_vm4, %v1521_v22  ;;  %3276 = vmatmul.mubr.msk.bf16.vlgmr.msra.gmra.mxu0 %vm778_vm4, %v1521_v22 }
 0x45a   :  { %1655 = vmatpush1.bf16.msra.mxu1 %v4498_v56  ;;  %3280 = vmatpush3.bf16.msra.mxu0 %v4510_v58 }
 0x45b   :  { %1656 = vmatprep.subr.bf16.mxu1 %v4504_v57  ;;  %3281 = vmatprep.subr.bf16.mxu0 %v3947_v26 }
 0x45c   :  { %1678 = vmatprep.mubr.bf16.mxu1 %v3946_v0  ;;  %3287 = vmatprep.mubr.msk.bf16.mxu0 %vm3948_vm5, %v3947_v26 }
 0x45e   :  { %1657 = vmatpush1.bf16.msra.mxu1 %v4520_v59  ;;  %3282 = vmatpush3.bf16.msra.mxu0 %v4533_v61 }
 0x45f   :  { %1658 = vmatprep.subr.bf16.mxu1 %v4527_v60  ;;  %3283 = vmatprep.subr.bf16.mxu0 %v3947_v26 }
 0x462   :  { %1659 = vmatpush1.bf16.msra.mxu1 %v4542_v62  ;;  %3284 = vmatpush3.bf16.msra.mxu0 %v4554_v1 }
 0x463   :  { %1660 = vmatprep.subr.bf16.mxu1 %v4548_v63  ;;  %3285 = vmatprep.subr.bf16.mxu0 %v3947_v26 }
 0x466   :  { %1661 = vmatpush1.bf16.msra.mxu1 %v4561_v2  ;;  %3286 = vmatpush3.bf16.msra.mxu0 %v4568_v3 }
 0x467   :  { %1775 = vmatprep.subr.bf16.mxu1 %v4493_v55  ;;  %3291 = vmatprep.subr.bf16.mxu0 %v3947_v26 }
 0x519   :  { %v1559_v23 = vpop.f32.mrf.mxu1  ;;  %v1600_v24 = vpop.f32.mrf.mxu0 }
 0x51a   :  { %v1607_v25 = vrot.slane %v1559_v23, 6  ;;  %v1626_v45 = vadd.f32 %v4631_v6, %v1600_v24 }
 0x51b   :  { %v1561_v27 = vpop.f32.mrf.mxu1  ;;  %v3277_v28 = vpop.f32.mrf.mxu0 }
 0x51c   :  { %v1609_v29 = vadd.f32 %v1607_v25, %v4625_v42  ;;  %v1617_v33 = vrot.slane %v1561_v27, 6  ;;  %v1628_v46 = vrot.slane %v1626_v45, 6 }
 0x51d   :  { %v1563_v30 = vpop.f32.mrf.mxu1  ;;  %v1603_v31 = vpop.f32.mrf.mxu0 }
 0x51e   :  { %v3080_v32 = vmul.f32 -1.442695, %v1609_v29  ;;  %v1619_v36 = vadd.f32 %v1617_v33, %v4628_v49 }
 0x51f   :  { %v1564_v34 = vpop.f32.mrf.mxu1  ;;  %v3278_v35 = vpop.f32.mrf.mxu0 }
 0x520   :  { %3655 = vpow2.f32 %v3080_v32  ;;  %v3081_v39 = vmul.f32 -1.442695, %v1619_v36 }
 0x522   :  { %3657 = vpow2.f32 %v3081_v39 }
 0x52d   :  { %v3656_v40 = vpop.eup %3655 }
 0x52e   :  { %v1613_v43 = vadd.f32 1.0, %v3656_v40 }
 0x52f   :  { %v3658_v44 = vpop.eup %3657 }
 0x530   :  { %3659 = vrcp.f32 %v1613_v43  ;;  %v1623_v16 = vadd.f32 1.0, %v3658_v44 }
 0x532   :  { %3661 = vrcp.f32 %v1623_v16 }
 0x53d   :  { %v3660_v47 = vpop.eup %3659 }
 0x53e   :  { %v1630_v48 = vmul.f32 %v3660_v47, %v1628_v46 }
 0x53f   :  { %v3662_v50 = vpop.eup %3661 }
 0x540   :  { %v1631_v14 = vadd.f32 %v1630_v48, %v4634_v10  ;;  %v1633_v52 = vsub.f32 1.0, %v3662_v50  ;;  %v1638_v4 = vmul.f32 %v3662_v50, %v1636_v51 }
 0x542   :  { %3663 = vtanh.f32 %v1631_v14 }
 0x54f   :  { %v3664_v53 = vpop.eup %3663 }
 0x550   :  { %v1634_v54 = vmul.f32 %v3664_v53, %v1633_v52 }
 0x552   :  { %v1639_v5 = vadd.f32 %v1638_v4, %v1634_v54 }
 0x554   :  { %v1640_v7 = vpack.c.bf16 %v1639_v5, %v1639_v5  ;;  %v1757_v40 = vrot.slane %v1639_v5, 6 }
 0x556   :  { %v1642_v8 = vrot.slane %v1640_v7, 1 }
 0x558   :  { %3082 = vmatmul.mubr.msk.bf16.vlgmr.msra.gmra.mxu1 %vm778_vm4, %v1642_v8  ;;  %3288 = vmatmul.mubr.msk.bf16.vlgmr.msra.gmra.mxu0 %vm778_vm4, %v1642_v8 }
 0x559   :  { %1776 = vmatpush1.bf16.msra.mxu1 %v4498_v56  ;;  %3292 = vmatpush3.bf16.msra.mxu0 %v4510_v58 }
 0x55a   :  { %1777 = vmatprep.subr.bf16.mxu1 %v4504_v57  ;;  %3293 = vmatprep.subr.bf16.mxu0 %v3947_v26 }
 0x55b   :  { %1799 = vmatprep.mubr.bf16.mxu1 %v3946_v0  ;;  %3299 = vmatprep.mubr.msk.bf16.mxu0 %vm3948_vm5, %v3947_v26 }
 0x55d   :  { %1778 = vmatpush1.bf16.msra.mxu1 %v4520_v59  ;;  %3294 = vmatpush3.bf16.msra.mxu0 %v4533_v61 }
 0x55e   :  { %1779 = vmatprep.subr.bf16.mxu1 %v4527_v60  ;;  %3295 = vmatprep.subr.bf16.mxu0 %v3947_v26 }
 0x561   :  { %1780 = vmatpush1.bf16.msra.mxu1 %v4542_v62  ;;  %3296 = vmatpush3.bf16.msra.mxu0 %v4554_v1 }
 0x562   :  { %1781 = vmatprep.subr.bf16.mxu1 %v4548_v63  ;;  %3297 = vmatprep.subr.bf16.mxu0 %v3947_v26 }
 0x565   :  { %1782 = vmatpush1.bf16.msra.mxu1 %v4561_v2  ;;  %3298 = vmatpush3.bf16.msra.mxu0 %v4568_v3 }
 0x566   :  { %1896 = vmatprep.subr.bf16.mxu1 %v4493_v55  ;;  %3303 = vmatprep.subr.bf16.mxu0 %v3947_v26 }
 0x618   :  { %v1680_v9 = vpop.f32.mrf.mxu1  ;;  %v1721_v11 = vpop.f32.mrf.mxu0 }
 0x619   :  { %v1728_v12 = vrot.slane %v1680_v9, 4  ;;  %v1747_v31 = vadd.f32 %v4631_v6, %v1721_v11 }
 0x61a   :  { %v1682_v15 = vpop.f32.mrf.mxu1  ;;  %v3289_v17 = vpop.f32.mrf.mxu0 }
 0x61b   :  { %v1730_v18 = vadd.f32 %v1728_v12, %v4625_v42  ;;  %v1738_v22 = vrot.slane %v1682_v15, 4  ;;  %v1749_v33 = vrot.slane %v1747_v31, 4 }
 0x61c   :  { %v1684_v19 = vpop.f32.mrf.mxu1  ;;  %v1724_v20 = vpop.f32.mrf.mxu0 }
 0x61d   :  { %v3084_v21 = vmul.f32 -1.442695, %v1730_v18  ;;  %v1740_v25 = vadd.f32 %v1738_v22, %v4628_v49 }
 0x61e   :  { %v1685_v23 = vpop.f32.mrf.mxu1  ;;  %v3290_v24 = vpop.f32.mrf.mxu0 }
 0x61f   :  { %3665 = vpow2.f32 %v3084_v21  ;;  %v3085_v27 = vmul.f32 -1.442695, %v1740_v25 }
 0x621   :  { %3667 = vpow2.f32 %v3085_v27 }
 0x62c   :  { %v3666_v28 = vpop.eup %3665 }
 0x62d   :  { %v1734_v29 = vadd.f32 1.0, %v3666_v28 }
 0x62e   :  { %v3668_v30 = vpop.eup %3667 }
 0x62f   :  { %3669 = vrcp.f32 %v1734_v29  ;;  %v1744_v32 = vadd.f32 1.0, %v3668_v30 }
 0x631   :  { %3671 = vrcp.f32 %v1744_v32 }
 0x63c   :  { %v3670_v34 = vpop.eup %3669 }
 0x63d   :  { %v1751_v35 = vmul.f32 %v3670_v34, %v1749_v33 }
 0x63e   :  { %v3672_v39 = vpop.eup %3671 }
 0x63f   :  { %v1752_v36 = vadd.f32 %v1751_v35, %v4634_v10  ;;  %v1754_v43 = vsub.f32 1.0, %v3672_v39  ;;  %v1759_v16 = vmul.f32 %v3672_v39, %v1757_v40 }
 0x641   :  { %3673 = vtanh.f32 %v1752_v36 }
 0x64e   :  { %v3674_v44 = vpop.eup %3673 }
 0x64f   :  { %v1755_v45 = vmul.f32 %v3674_v44, %v1754_v43 }
 0x651   :  { %v1760_v46 = vadd.f32 %v1759_v16, %v1755_v45 }
 0x653   :  { %v1761_v47 = vpack.c.bf16 %v1760_v46, %v1760_v46  ;;  %v1878_v27 = vrot.slane %v1760_v46, 6 }
 0x655   :  { %v1763_v48 = vrot.slane %v1761_v47, 2 }
 0x657   :  { %3086 = vmatmul.mubr.msk.bf16.vlgmr.msra.gmra.mxu1 %vm778_vm4, %v1763_v48  ;;  %3300 = vmatmul.mubr.msk.bf16.vlgmr.msra.gmra.mxu0 %vm778_vm4, %v1763_v48 }
 0x658   :  { %1897 = vmatpush1.bf16.msra.mxu1 %v4498_v56  ;;  %3304 = vmatpush3.bf16.msra.mxu0 %v4510_v58 }
 0x659   :  { %1898 = vmatprep.subr.bf16.mxu1 %v4504_v57  ;;  %3305 = vmatprep.subr.bf16.mxu0 %v3947_v26 }
 0x65a   :  { %1920 = vmatprep.mubr.bf16.mxu1 %v3946_v0  ;;  %3311 = vmatprep.mubr.msk.bf16.mxu0 %vm3948_vm5, %v3947_v26 }
 0x65c   :  { %1899 = vmatpush1.bf16.msra.mxu1 %v4520_v59  ;;  %3306 = vmatpush3.bf16.msra.mxu0 %v4533_v61 }
 0x65d   :  { %1900 = vmatprep.subr.bf16.mxu1 %v4527_v60  ;;  %3307 = vmatprep.subr.bf16.mxu0 %v3947_v26 }
 0x660   :  { %1901 = vmatpush1.bf16.msra.mxu1 %v4542_v62  ;;  %3308 = vmatpush3.bf16.msra.mxu0 %v4554_v1 }
 0x661   :  { %1902 = vmatprep.subr.bf16.mxu1 %v4548_v63  ;;  %3309 = vmatprep.subr.bf16.mxu0 %v3947_v26 }
 0x664   :  { %1903 = vmatpush1.bf16.msra.mxu1 %v4561_v2  ;;  %3310 = vmatpush3.bf16.msra.mxu0 %v4568_v3 }
 0x665   :  { %2006 = vmatprep.subr.bf16.mxu1 %v4493_v55  ;;  %3315 = vmatprep.subr.bf16.mxu0 %v3947_v26 }
 0x717   :  { %v1801_v14 = vpop.f32.mrf.mxu1  ;;  %v1842_v50 = vpop.f32.mrf.mxu0 }
 0x718   :  { %v1849_v51 = vrot.slane %v1801_v14, 2  ;;  %v1868_v20 = vadd.f32 %v4631_v6, %v1842_v50 }
 0x719   :  { %v1803_v52 = vpop.f32.mrf.mxu1  ;;  %v3301_v53 = vpop.f32.mrf.mxu0 }
 0x71a   :  { %v1851_v54 = vadd.f32 %v1849_v51, %v4625_v42  ;;  %v1859_v8 = vrot.slane %v1803_v52, 2  ;;  %v1870_v22 = vrot.slane %v1868_v20, 2 }
 0x71b   :  { %v1805_v4 = vpop.f32.mrf.mxu1  ;;  %v1845_v5 = vpop.f32.mrf.mxu0 }
 0x71c   :  { %v3088_v7 = vmul.f32 -1.442695, %v1851_v54  ;;  %v1861_v12 = vadd.f32 %v1859_v8, %v4628_v49 }
 0x71d   :  { %v1806_v9 = vpop.f32.mrf.mxu1  ;;  %v3302_v11 = vpop.f32.mrf.mxu0 }
 0x71e   :  { %3675 = vpow2.f32 %v3088_v7  ;;  %v3089_v15 = vmul.f32 -1.442695, %v1861_v12 }
 0x720   :  { %3677 = vpow2.f32 %v3089_v15 }
 0x72b   :  { %v3676_v17 = vpop.eup %3675 }
 0x72c   :  { %v1855_v18 = vadd.f32 1.0, %v3676_v17 }
 0x72d   :  { %v3678_v19 = vpop.eup %3677 }
 0x72e   :  { %3679 = vrcp.f32 %v1855_v18  ;;  %v1865_v21 = vadd.f32 1.0, %v3678_v19 }
 0x730   :  { %3681 = vrcp.f32 %v1865_v21 }
 0x73b   :  { %v3680_v42 = vpop.eup %3679 }
 0x73c   :  { %v1872_v23 = vmul.f32 %v3680_v42, %v1870_v22 }
 0x73d   :  { %v3682_v25 = vpop.eup %3681 }
 0x73e   :  { %v1873_v24 = vadd.f32 %v1872_v23, %v4634_v10  ;;  %v1875_v28 = vsub.f32 1.0, %v3682_v25  ;;  %v1880_v30 = vmul.f32 %v3682_v25, %v1878_v27 }
 0x740   :  { %3683 = vtanh.f32 %v1873_v24 }
 0x74d   :  { %v3684_v49 = vpop.eup %3683 }
 0x74e   :  { %v1876_v29 = vmul.f32 %v3684_v49, %v1875_v28 }
 0x750   :  { %v1881_v31 = vadd.f32 %v1880_v30, %v1876_v29 }
 0x752   :  { %v1882_v32 = vpack.c.bf16 %v1881_v31, %v1881_v31  ;;  %v1990_v7 = vrot.slane %v1881_v31, 6 }
 0x754   :  { %v1884_v33 = vrot.slane %v1882_v32, 3 }
 0x756   :  { %3090 = vmatmul.mubr.msk.bf16.vlgmr.msra.gmra.mxu1 %vm778_vm4, %v1884_v33  ;;  %3312 = vmatmul.mubr.msk.bf16.vlgmr.msra.gmra.mxu0 %vm778_vm4, %v1884_v33 }
 0x757   :  { %2007 = vmatpush1.bf16.msra.mxu1 %v4498_v56  ;;  %3316 = vmatpush3.bf16.msra.mxu0 %v4510_v58 }
 0x758   :  { %2008 = vmatprep.subr.bf16.mxu1 %v4504_v57  ;;  %3317 = vmatprep.subr.bf16.mxu0 %v3947_v26 }
 0x759   :  { %2030 = vmatprep.mubr.bf16.mxu1 %v3946_v0  ;;  %3323 = vmatprep.mubr.msk.bf16.mxu0 %vm3948_vm5, %v3947_v26 }
 0x75b   :  { %2009 = vmatpush1.bf16.msra.mxu1 %v4520_v59  ;;  %3318 = vmatpush3.bf16.msra.mxu0 %v4533_v61 }
 0x75c   :  { %2010 = vmatprep.subr.bf16.mxu1 %v4527_v60  ;;  %3319 = vmatprep.subr.bf16.mxu0 %v3947_v26 }
 0x75f   :  { %2011 = vmatpush1.bf16.msra.mxu1 %v4542_v62  ;;  %3320 = vmatpush3.bf16.msra.mxu0 %v4554_v1 }
 0x760   :  { %2012 = vmatprep.subr.bf16.mxu1 %v4548_v63  ;;  %3321 = vmatprep.subr.bf16.mxu0 %v3947_v26 }
 0x763   :  { %2013 = vmatpush1.bf16.msra.mxu1 %v4561_v2  ;;  %3322 = vmatpush3.bf16.msra.mxu0 %v4568_v3 }
 0x764   :  { %2127 = vmatprep.subr.bf16.mxu1 %v4493_v55  ;;  %3327 = vmatprep.subr.bf16.mxu0 %v3947_v26 }
 0x816   :  { %v1922_v10 = vpop.f32.mrf.mxu1  ;;  %v1963_v34 = vpop.f32.mrf.mxu0 }
 0x817   :  { %v1969_v35 = vadd.f32 %v1922_v10, %v4619_v37  ;;  %v1983_v52 = vadd.f32 %v4631_v6, %v1963_v34 }
 0x818   :  { %v1924_v36 = vpop.f32.mrf.mxu1  ;;  %v3313_v39 = vpop.f32.mrf.mxu0 }
 0x819   :  { %v3092_v40 = vmul.f32 -1.442695, %v1969_v35  ;;  %v1976_v46 = vadd.f32 %v1924_v36, %v4623_v41 }
 0x81a   :  { %v1926_v43 = vpop.f32.mrf.mxu1  ;;  %v1966_v44 = vpop.f32.mrf.mxu0 }
 0x81b   :  { %3685 = vpow2.f32 %v3092_v40  ;;  %v3093_v47 = vmul.f32 -1.442695, %v1976_v46 }
 0x81c   :  { %v1927_v45 = vpop.f32.mrf.mxu1  ;;  %v3314_v16 = vpop.f32.mrf.mxu0 }
 0x81d   :  { %3687 = vpow2.f32 %v3093_v47 }
 0x828   :  { %v3686_v48 = vpop.eup %3685 }
 0x829   :  { %v1973_v14 = vadd.f32 1.0, %v3686_v48 }
 0x82a   :  { %v3688_v50 = vpop.eup %3687 }
 0x82b   :  { %3689 = vrcp.f32 %v1973_v14  ;;  %v1980_v51 = vadd.f32 1.0, %v3688_v50 }
 0x82d   :  { %3691 = vrcp.f32 %v1980_v51 }
 0x838   :  { %v3690_v53 = vpop.eup %3689 }
 0x839   :  { %v1984_v54 = vmul.f32 %v3690_v53, %v1983_v52 }
 0x83a   :  { %v3692_v5 = vpop.eup %3691 }
 0x83b   :  { %v1985_v4 = vadd.f32 %v1984_v54, %v4621_v38  ;;  %v1987_v8 = vsub.f32 1.0, %v3692_v5  ;;  %v1992_v12 = vmul.f32 %v3692_v5, %v1990_v7 }
 0x83d   :  { %3693 = vtanh.f32 %v1985_v4 }
 0x84a   :  { %v3694_v9 = vpop.eup %3693 }
 0x84b   :  { %v1988_v11 = vmul.f32 %v3694_v9, %v1987_v8 }
 0x84d   :  { %v1993_v15 = vadd.f32 %v1992_v12, %v1988_v11 }
 0x84f   :  { %v1994_v17 = vpack.c.bf16 %v1993_v15, %v1993_v15  ;;  %v2109_v43 = vrot.slane %v1993_v15, 6 }
 0x851   :  { %3094 = vmatmul.mubr.msk.bf16.vlgmr.msra.gmra.mxu1 %vm778_vm4, %v1994_v17  ;;  %3324 = vmatmul.mubr.msk.bf16.vlgmr.msra.gmra.mxu0 %vm778_vm4, %v1994_v17 }
 0x852   :  { %2128 = vmatpush1.bf16.msra.mxu1 %v4498_v56  ;;  %3328 = vmatpush3.bf16.msra.mxu0 %v4510_v58 }
 0x853   :  { %2129 = vmatprep.subr.bf16.mxu1 %v4504_v57  ;;  %3329 = vmatprep.subr.bf16.mxu0 %v3947_v26 }
 0x854   :  { %2151 = vmatprep.mubr.bf16.mxu1 %v3946_v0  ;;  %3335 = vmatprep.mubr.msk.bf16.mxu0 %vm3948_vm5, %v3947_v26 }
 0x856   :  { %2130 = vmatpush1.bf16.msra.mxu1 %v4520_v59  ;;  %3330 = vmatpush3.bf16.msra.mxu0 %v4533_v61 }
 0x857   :  { %2131 = vmatprep.subr.bf16.mxu1 %v4527_v60  ;;  %3331 = vmatprep.subr.bf16.mxu0 %v3947_v26 }
 0x85a   :  { %2132 = vmatpush1.bf16.msra.mxu1 %v4542_v62  ;;  %3332 = vmatpush3.bf16.msra.mxu0 %v4554_v1 }
 0x85b   :  { %2133 = vmatprep.subr.bf16.mxu1 %v4548_v63  ;;  %3333 = vmatprep.subr.bf16.mxu0 %v3947_v26 }
 0x85e   :  { %2134 = vmatpush1.bf16.msra.mxu1 %v4561_v2  ;;  %3334 = vmatpush3.bf16.msra.mxu0 %v4568_v3 }
 0x85f   :  { %2248 = vmatprep.subr.bf16.mxu1 %v4493_v55  ;;  %3339 = vmatprep.subr.bf16.mxu0 %v3947_v26 }
 0x911   :  { %v2032_v18 = vpop.f32.mrf.mxu1  ;;  %v2073_v19 = vpop.f32.mrf.mxu0 }
 0x912   :  { %v2080_v20 = vrot.slane %v2032_v18, 6  ;;  %v2099_v33 = vadd.f32 %v4631_v6, %v2073_v19 }
 0x913   :  { %v2034_v21 = vpop.f32.mrf.mxu1  ;;  %v3325_v22 = vpop.f32.mrf.mxu0 }
 0x914   :  { %v2082_v42 = vadd.f32 %v2080_v20, %v4619_v37  ;;  %v2090_v27 = vrot.slane %v2034_v21, 6  ;;  %v2101_v34 = vrot.slane %v2099_v33, 6  ;;  %v3600_v33 = vld [vmem:[%s4962_s15 + $0x58] sm:$0xff]  }
 0x915   :  { %v2036_v23 = vpop.f32.mrf.mxu1  ;;  %v2076_v24 = vpop.f32.mrf.mxu0 }
 0x916   :  { %v3096_v25 = vmul.f32 -1.442695, %v2082_v42  ;;  %v2092_v29 = vadd.f32 %v2090_v27, %v4623_v41  ;;  %v3590_v23 = vld [vmem:[%s4962_s15 + $0x78] sm:$0xff]   ;;  %v3593_v27 = vld [vmem:[%s4962_s15 + $0x30] sm:$0xff]  }
 0x917   :  { %v2037_v28 = vpop.f32.mrf.mxu1  ;;  %v3326_v49 = vpop.f32.mrf.mxu0  ;;  %v3591_v24 = vld [vmem:[%s4962_s15 + $0x38] sm:$0xff]  }
 0x918   :  { %3695 = vpow2.f32 %v3096_v25  ;;  %v3097_v30 = vmul.f32 -1.442695, %v2092_v29  ;;  %v3592_v25 = vld [vmem:[%s4962_s15 + $0x70] sm:$0xff]   ;;  %v3594_v28 = vld [vmem:[%s4962_s15 + $0x68] sm:$0xff]  }
 0x919   :  { %v3596_v49 = vld [vmem:[%s4962_s15 + $0xb8] ss:$0 sps:$4 sm:$0x11]   ;;  %v3595_v29 = vld [vmem:[%s4962_s15 + $0x28] sm:$0xff]  }
 0x91a   :  { %3697 = vpow2.f32 %v3097_v30  ;;  %v2580_v30 = vsel %vm483_vm0, %v3596_v49, 0 }
 0x925   :  { %v3696_v55 = vpop.eup %3695 }
 0x926   :  { %v2086_v31 = vadd.f32 1.0, %v3696_v55  ;;  %v3597_v55 = vld [vmem:[%s4962_s15 + $0x60] sm:$0xff]  }
 0x927   :  { %v3698_v32 = vpop.eup %3697 }
 0x928   :  { %3699 = vrcp.f32 %v2086_v31  ;;  %v2096_v10 = vadd.f32 1.0, %v3698_v32  ;;  %v3598_v31 = vld [vmem:[%s4962_s15 + $0x20] sm:$0xff]   ;;  %v3599_v32 = vld [vmem:[%s4962_s15 + $0xb0] sm:$0xff]  }
 0x92a   :  { %3701 = vrcp.f32 %v2096_v10  ;;  %v3601_v10 = vld [vmem:[%s4962_s15 + $0x18] sm:$0xff]  }
 0x935   :  { %v3700_v35 = vpop.eup %3699 }
 0x936   :  { %v2103_v36 = vmul.f32 %v3700_v35, %v2101_v34  ;;  %v3602_v34 = vld [vmem:[%s4962_s15 + $0xa8] sm:$0xff]   ;;  %v3603_v35 = vld [vmem:[%s4962_s15 + $0x50] sm:$0xff]  }
 0x937   :  { %v3702_v40 = vpop.eup %3701 }
 0x938   :  { %v2104_v39 = vadd.f32 %v2103_v36, %v4621_v38  ;;  %v2106_v44 = vsub.f32 1.0, %v3702_v40  ;;  %v2111_v46 = vmul.f32 %v3702_v40, %v2109_v43  ;;  %v3604_v36 = vld [vmem:[%s4962_s15 + $0x10] sm:$0xff]   ;;  %v3949_v40 = vmov 1983009808  }
 0x939   :  { %v2368_v43 = vunpack.c.l.s4 %v3949_v40 }
 0x93a   :  { %3703 = vtanh.f32 %v2104_v39  ;;  %v3605_v39 = vld [vmem:[%s4962_s15 + $0xa0] sm:$0xff]  }
 0x947   :  { %v3704_v45 = vpop.eup %3703 }
 0x948   :  { %v2107_v16 = vmul.f32 %v3704_v45, %v2106_v44  ;;  %v2369_v44 = vunpack.c.0.s8 %v2368_v43  ;;  %v3606_v45 = vld [vmem:[%s4962_s15 + $0x48] sm:$0xff]  }
 0x94a   :  { %v2112_v47 = vadd.f32 %v2111_v46, %v2107_v16  ;;  %v3607_v16 = vld [vmem:[%s4962_s15 + $0x8] sm:$0xff]   ;;  %v3608_v46 = vld [vmem:[%s4962_s15 + $0x98] sm:$0xff]  }
 0x94c   :  { %v2113_v48 = vpack.c.bf16 %v2112_v47, %v2112_v47  ;;  %v2230_v15 = vrot.slane %v2112_v47, 6  ;;  %v2372_v47 = vsub.s32 %v2369_v44, %v4310_v13 }
 0x94e   :  { %v2115_v14 = vrot.slane %v2113_v48, 1  ;;  %v2364_v48 = vld [vmem:[#allocation2] sm:$0x3f] }
 0x950   :  { %3098 = vmatmul.mubr.msk.bf16.vlgmr.msra.gmra.mxu1 %vm778_vm4, %v2115_v14  ;;  %3336 = vmatmul.mubr.msk.bf16.vlgmr.msra.gmra.mxu0 %vm778_vm4, %v2115_v14  ;;  %v2373_v14 = vrot.slane %v2364_v48, %v2372_v47 }
 0x951   :  { %2249 = vmatpush1.bf16.msra.mxu1 %v4498_v56  ;;  %3340 = vmatpush3.bf16.msra.mxu0 %v4510_v58 }
 0x952   :  { %2250 = vmatprep.subr.bf16.mxu1 %v4504_v57  ;;  %3341 = vmatprep.subr.bf16.mxu0 %v3947_v26  ;;  %v2381_v13 = vcombine.high %v2373_v14, %v2373_v14 }
 0x953   :  { %2272 = vmatprep.mubr.bf16.mxu1 %v3946_v0  ;;  %3347 = vmatprep.mubr.msk.bf16.mxu0 %vm3948_vm5, %v3947_v26 }
 0x955   :  { %2251 = vmatpush1.bf16.msra.mxu1 %v4520_v59  ;;  %3342 = vmatpush3.bf16.msra.mxu0 %v4533_v61 }
 0x956   :  { %2252 = vmatprep.subr.bf16.mxu1 %v4527_v60  ;;  %3343 = vmatprep.subr.bf16.mxu0 %v3947_v26 }
 0x959   :  { %2253 = vmatpush1.bf16.msra.mxu1 %v4542_v62  ;;  %3344 = vmatpush3.bf16.msra.mxu0 %v4554_v1 }
 0x95a   :  { %2254 = vmatprep.subr.bf16.mxu1 %v4548_v63  ;;  %3345 = vmatprep.subr.bf16.mxu0 %v3947_v26 }
 0x95d   :  { %2255 = vmatpush1.bf16.msra.mxu1 %v4561_v2  ;;  %3346 = vmatpush3.bf16.msra.mxu0 %v4568_v3 }
 0x95e   :  { %3351 = vmatprep.subr.bf16.mxu0 %v3947_v26  ;;  %3195 = vmatprep.subr.bf16.mxu1 %v3590_v23 }
 0xa10   :  { %v2153_v0 = vpop.f32.mrf.mxu1  ;;  %v2194_v56 = vpop.f32.mrf.mxu0 }
 0xa11   :  { %v2201_v57 = vrot.slane %v2153_v0, 4  ;;  %v2220_v4 = vadd.f32 %v4631_v6, %v2194_v56  ;;  %v3609_v0 = vld [vmem:[%s4962_s15 + $0x40] sm:$0xff]  }
 0xa12   :  { %v2155_v58 = vpop.f32.mrf.mxu1  ;;  %v3337_v59 = vpop.f32.mrf.mxu0  ;;  %v3610_v56 = vld [vmem:[%s4962_s15] sm:$0xff]  }
 0xa13   :  { %v2203_v60 = vadd.f32 %v2201_v57, %v4619_v37  ;;  %v2211_v50 = vrot.slane %v2155_v58, 4  ;;  %v2222_v7 = vrot.slane %v2220_v4, 4  ;;  %v3611_v57 = vld [vmem:[%s4962_s15 + $0x90] sm:$0xff]   ;;  %v2386_v58 = vpack.c.bf16 %v2381_v13, %v2381_v13  ;;  %v3622_v4 = vld [vmem:[%s4964_s17 + $0x20] sm:$0xff]  }
 0xa14   :  { %v2157_v61 = vpop.f32.mrf.mxu1  ;;  %v2197_v62 = vpop.f32.mrf.mxu0  ;;  %v2385_v59 = vpack.c.bf16 %v2373_v14, %v2373_v14 }
 0xa15   :  { %v3100_v1 = vmul.f32 -1.442695, %v2203_v60  ;;  %v2213_v2 = vadd.f32 %v2211_v50, %v4623_v41  ;;  %v2366_v60 = vcombine.high %v2364_v48, %v2364_v48  ;;  %v3613_v61 = vld [vmem:[%s4962_s15 + $0x88] sm:$0xff]   ;;  %v3615_v62 = vld [vmem:[%s4961_s14 + $0x18] sm:$0xff]   ;;  %v3614_v50 = vld [vmem:[%s4962_s15 + $0x80] sm:$0xff]  }
 0xa16   :  { %v2158_v63 = vpop.f32.mrf.mxu1  ;;  %v3338_v51 = vpop.f32.mrf.mxu0 }
 0xa17   :  { %3705 = vpow2.f32 %v3100_v1  ;;  %v3101_v52 = vmul.f32 -1.442695, %v2213_v2  ;;  %v2380_v1 = vrot.slane %v2366_v60, %v2372_v47  ;;  %v3616_v63 = vld [vmem:[%s4961_s14 + $0x10] sm:$0xff]   ;;  %v3617_v2 = vld [vmem:[%s4961_s14 + $0x8] sm:$0xff]  }
 0xa19   :  { %3707 = vpow2.f32 %v3101_v52  ;;  %v2387_v51 = vpack.c.bf16 %v2380_v1, %v2380_v1  ;;  %v3618_v52 = vld [vmem:[%s4961_s14] sm:$0xff]  }
 0xa24   :  { %v3706_v3 = vpop.eup %3705 }
 0xa25   :  { %v2207_v53 = vadd.f32 1.0, %v3706_v3  ;;  %v3619_v3 = vld [vmem:[%s4964_s17 + $0x38] sm:$0xff]  }
 0xa26   :  { %v3708_v54 = vpop.eup %3707 }
 0xa27   :  { %3709 = vrcp.f32 %v2207_v53  ;;  %v2217_v5 = vadd.f32 1.0, %v3708_v54  ;;  %v3620_v53 = vld [vmem:[%s4964_s17 + $0x30] sm:$0xff]   ;;  %v3621_v54 = vld [vmem:[%s4964_s17 + $0x28] sm:$0xff]  }
 0xa29   :  { %3711 = vrcp.f32 %v2217_v5  ;;  %v3623_v5 = vld [vmem:[%s4964_s17 + $0x18] sm:$0xff]  }
 0xa34   :  { %v3710_v8 = vpop.eup %3709 }
 0xa35   :  { %v2224_v9 = vmul.f32 %v3710_v8, %v2222_v7  ;;  %v3624_v7 = vld [vmem:[%s4964_s17 + $0x10] sm:$0xff]  }
 0xa36   :  { %v3712_v12 = vpop.eup %3711 }
 0xa37   :  { %v2225_v11 = vadd.f32 %v2224_v9, %v4621_v38  ;;  %v2227_v17 = vsub.f32 1.0, %v3712_v12  ;;  %v2232_v20 = vmul.f32 %v3712_v12, %v2230_v15 }
 0xa39   :  { %3713 = vtanh.f32 %v2225_v11 }
 0xa46   :  { %v3714_v18 = vpop.eup %3713 }
 0xa47   :  { %v2228_v19 = vmul.f32 %v3714_v18, %v2227_v17 }
 0xa49   :  { %v4786_v21 = vadd.f32 %v2232_v20, %v2228_v19 }
 0xa4b   :  { %v2234_v22 = vpack.c.bf16 %v4786_v21, %v4786_v21 }
 0xa4d   :  { %v2236_v42 = vrot.slane %v2234_v22, 2 }
 0xa4f   :  { %3102 = vmatmul.mubr.msk.bf16.vlgmr.msra.gmra.mxu1 %vm778_vm4, %v2236_v42  ;;  %3348 = vmatmul.mubr.msk.bf16.vlgmr.msra.gmra.mxu0 %vm778_vm4, %v2236_v42 }
 0xa50   :  { %3367 = vmatprep.mubr.msk.bf16.mxu0 %vm3948_vm5, %v3947_v26  ;;  %3196 = vmatpush3.bf16.msra.mxu1 %v3591_v24 }
 0xa51   :  { %3197 = vmatprep.subr.bf16.mxu1 %v3592_v25  ;;  %3352 = vmatpush3.bf16.msra.mxu0 %v2580_v30 }
 0xa52   :  { %3353 = vmatprep.subr.bf16.mxu0 %v3947_v26  ;;  %2614 = vmatprep.mubr.bf16.mxu1 %v2386_v58  ;;  %v3136_v58 = vld [vmem:[#allocation13] ss:$0 sm:$0xff] }
 0xa54   :  { %3198 = vmatpush3.bf16.msra.mxu1 %v3593_v27 }
 0xa55   :  { %3199 = vmatprep.subr.bf16.mxu1 %v3594_v28  ;;  %3354 = vmatpush3.bf16.msra.mxu0 %v3599_v32 }
 0xa56   :  { %3355 = vmatprep.subr.bf16.mxu0 %v3947_v26 }
 0xa58   :  { %3200 = vmatpush3.bf16.msra.mxu1 %v3595_v29 }
 0xa59   :  { %3201 = vmatprep.subr.bf16.mxu1 %v3597_v55  ;;  %3356 = vmatpush3.bf16.msra.mxu0 %v3602_v34 }
 0xa5a   :  { %3357 = vmatprep.subr.bf16.mxu0 %v3947_v26 }
 0xa5c   :  { %3202 = vmatpush3.bf16.msra.mxu1 %v3598_v31 }
 0xa5d   :  { %3203 = vmatprep.subr.bf16.mxu1 %v3600_v33  ;;  %3358 = vmatpush3.bf16.msra.mxu0 %v3605_v39 }
 0xa5e   :  { %3359 = vmatprep.subr.bf16.mxu0 %v3947_v26 }
 0xa60   :  { %3204 = vmatpush3.bf16.msra.mxu1 %v3601_v10  ;;  %v2351_v10 = vrot.slane %v4786_v21, 6 }
 0xa61   :  { %3205 = vmatprep.subr.bf16.mxu1 %v3603_v35  ;;  %3360 = vmatpush3.bf16.msra.mxu0 %v3608_v46 }
 0xa62   :  { %3361 = vmatprep.subr.bf16.mxu0 %v3947_v26 }
 0xa64   :  { %3206 = vmatpush3.bf16.msra.mxu1 %v3604_v36 }
 0xa65   :  { %3207 = vmatprep.subr.bf16.mxu1 %v3606_v45  ;;  %3362 = vmatpush3.bf16.msra.mxu0 %v3611_v57  ;;  %v3627_v57 = vld [vmem:[%s4966_s19 + $0x8] sm:$0xff]  }
 0xa66   :  { %3363 = vmatprep.subr.bf16.mxu0 %v3947_v26 }
 0xa68   :  { %3208 = vmatpush3.bf16.msra.mxu1 %v3607_v16 }
 0xa69   :  { %3209 = vmatprep.subr.bf16.mxu1 %v3609_v0  ;;  %3364 = vmatpush3.bf16.msra.mxu0 %v3613_v61  ;;  %v3625_v0 = vld [vmem:[%s4964_s17 + $0x8] sm:$0xff]  }
 0xa6a   :  { %3365 = vmatprep.subr.bf16.mxu0 %v3947_v26 }
 0xa6c   :  { %3210 = vmatpush3.bf16.msra.mxu1 %v3610_v56  ;;  %v3626_v56 = vld [vmem:[%s4964_s17] sm:$0xff]   ;;  %s3950_s17 = smov [#allocation17]  }
 0xa6d   :  { %3371 = vmatprep.subr.bf16.mxu1 %v3947_v26  ;;  %3366 = vmatpush3.bf16.msra.mxu0 %v3614_v50  ;;  %s2930_s28 = sshll.u32 %s3950_s17, 4  ;;  %s2931_s28 = int_to_ptr.vmem [resolvable:$true] %s2930_s28 }
 0xa6e   :  { %3383 = vmatprep.subr.bf16.mxu0 %v3947_v26  ;;  %p3910_p4 = scmp.lt.s32.totalorder %s2931_s28, %s2931_s28 }
 0xa6f   :  { %2615 = vmatmul.mubr.bf16.vlgmr.msra.gmra.mxu1 %v2385_v59 }
 0xa70   :  { %3372 = vmatpush3.bf16.msra.mxu1 %v3615_v62  ;;  %3379 = vmatprep.mubr.msk.bf16.mxu1 %vm3948_vm5, %v3947_v26 }
 0xa71   :  { %3373 = vmatprep.subr.bf16.mxu1 %v3947_v26  ;;  %3368 = vmatmul.mubr.msk.bf16.vlgmr.msra.gmra.mxu0 %vm479_vm1, %v2387_v51  ;;  %v3137_v51 = vld [vmem:[#allocation14] ss:$0 sm:$0xff] }
 0xa72   :  { %3399 = vmatprep.mubr.msk.bf16.mxu0 %vm3948_vm5, %v3947_v26  ;;  %3384 = vmatpush3.bf16.msra.mxu0 %v3619_v3 }
 0xa73   :  { %3385 = vmatprep.subr.bf16.mxu0 %v3947_v26 }
 0xa74   :  { %3374 = vmatpush3.bf16.msra.mxu1 %v3616_v63  ;;  %v3628_v63 = vld [vmem:[%s4966_s19] sm:$0xff]   ;;  %s3905_s19 = scalar_lea.vmem %s2931_s28, 32 }
 0xa75   :  { %3375 = vmatprep.subr.bf16.mxu1 %v3947_v26  ;;  %p3906_p3 = scmp.ne.s32.totalorder %s2931_s28, %s3905_s19  ;;  %p3911_p5 = scmp.lt.s32.totalorder %s3905_s19, %s3905_s19 }
 0xa76   :  { %3386 = vmatpush3.bf16.msra.mxu0 %v3620_v53 }
 0xa77   :  { %3387 = vmatprep.subr.bf16.mxu0 %v3947_v26  ;;  %p3912_p6 = por %p3911_p5, %p3910_p4 }
 0xa78   :  { %3376 = vmatpush3.bf16.msra.mxu1 %v3617_v2 }
 0xa79   :  { %3377 = vmatprep.subr.bf16.mxu1 %v3947_v26  ;;  %p3913_p7 = pnand %p3912_p6, %p3906_p3 }
 0xa7a   :  { %3388 = vmatpush3.bf16.msra.mxu0 %v3621_v54 }
 0xa7b   :  { %3389 = vmatprep.subr.bf16.mxu0 %v3947_v26 }
 0xa7c   :  { %3378 = vmatpush3.bf16.msra.mxu1 %v3618_v52 }
 0xa7d   :  { %3403 = vmatprep.subr.bf16.mxu1 %v3947_v26 }
 0xa7e   :  { %3390 = vmatpush3.bf16.msra.mxu0 %v3622_v4 }
 0xa7f   :  { %3391 = vmatprep.subr.bf16.mxu0 %v3947_v26 }
 0xa82   :  { %3392 = vmatpush3.bf16.msra.mxu0 %v3623_v5  ;;  %v3146_v5 = vld [vmem:[#allocation16] ss:$0 sm:$0xff] }
 0xa83   :  { %3393 = vmatprep.subr.bf16.mxu0 %v3947_v26 }
 0xa86   :  { %3394 = vmatpush3.bf16.msra.mxu0 %v3624_v7 }
 0xa87   :  { %3395 = vmatprep.subr.bf16.mxu0 %v3947_v26 }
 0xa8a   :  { %3396 = vmatpush3.bf16.msra.mxu0 %v3625_v0 }
 0xa8b   :  { %3397 = vmatprep.subr.bf16.mxu0 %v3947_v26 }
 0xa8e   :  { %3398 = vmatpush3.bf16.msra.mxu0 %v3626_v56 }
 0xb0f   :  { %v2274_v8 = vpop.f32.mrf.mxu1  ;;  %v2315_v9 = vpop.f32.mrf.mxu0 }
 0xb10   :  { %v2322_v11 = vrot.slane %v2274_v8, 2  ;;  %v2341_v29 = vadd.f32 %v4631_v6, %v2315_v9 }
 0xb11   :  { %v2276_v12 = vpop.f32.mrf.mxu1  ;;  %v3349_v15 = vpop.f32.mrf.mxu0 }
 0xb12   :  { %v2324_v17 = vadd.f32 %v2322_v11, %v4619_v37  ;;  %v2332_v22 = vrot.slane %v2276_v12, 2  ;;  %v2343_v55 = vrot.slane %v2341_v29, 2 }
 0xb13   :  { %v2278_v18 = vpop.f32.mrf.mxu1  ;;  %v2318_v19 = vpop.f32.mrf.mxu0 }
 0xb14   :  { %v3104_v20 = vmul.f32 -1.442695, %v2324_v17  ;;  %v2334_v24 = vadd.f32 %v2332_v22, %v4623_v41 }
 0xb15   :  { %v2279_v42 = vpop.f32.mrf.mxu1  ;;  %v3350_v23 = vpop.f32.mrf.mxu0 }
 0xb16   :  { %3715 = vpow2.f32 %v3104_v20  ;;  %v3105_v25 = vmul.f32 -1.442695, %v2334_v24 }
 0xb18   :  { %3717 = vpow2.f32 %v3105_v25 }
 0xb23   :  { %v3716_v27 = vpop.eup %3715 }
 0xb24   :  { %v2328_v28 = vadd.f32 1.0, %v3716_v27 }
 0xb25   :  { %v3718_v49 = vpop.eup %3717 }
 0xb26   :  { %3719 = vrcp.f32 %v2328_v28  ;;  %v2338_v30 = vadd.f32 1.0, %v3718_v49 }
 0xb28   :  { %3721 = vrcp.f32 %v2338_v30 }
 0xb2f   :  { %v3211_v6 = vpop.f32.mrf.mxu1 }
 0xb31   :  { %v3212_v44 = vpop.f32.mrf.mxu1  ;;  %v2656_v46 = vpop.f32.mrf.mxu0 }
 0xb32   :  { %v3213_v45 = vadd.f32 %v3212_v44, %v3211_v6 }
 0xb33   :  { %v3720_v37 = vpop.eup %3719  ;;  %v3369_v21 = vpop.f32.mrf.mxu0 }
 0xb34   :  { %v2345_v31 = vmul.f32 %v3720_v37, %v2343_v55  ;;  %v2657_v47 = vadd.f32 %v3213_v45, %v2656_v46 }
 0xb35   :  { %v3722_v33 = vpop.eup %3721  ;;  %v2659_v48 = vpop.f32.mrf.mxu0 }
 0xb36   :  { %v2346_v32 = vadd.f32 %v2345_v31, %v4621_v38  ;;  %v2348_v41 = vsub.f32 1.0, %v3722_v33  ;;  %v2353_v36 = vmul.f32 %v3722_v33, %v2351_v10  ;;  %v3214_v38 = vpop.f32.mrf.mxu1 }
 0xb37   :  { %v3370_v14 = vpop.f32.mrf.mxu0 }
 0xb38   :  { %3723 = vtanh.f32 %v2346_v32  ;;  %v3215_v16 = vpop.f32.mrf.mxu1 }
 0xb45   :  { %v3724_v34 = vpop.eup %3723 }
 0xb46   :  { %v2349_v35 = vmul.f32 %v3724_v34, %v2348_v41 }
 0xb48   :  { %v2354_v39 = vadd.f32 %v2353_v36, %v2349_v35 }
 0xb4a   :  { %v2355_v40 = vpack.c.bf16 %v2354_v39, %v2354_v39 }
 0xb4c   :  { %v2663_v43 = vrot.slane %v2355_v40, 3 }
 0xb4e   :  { %3380 = vmatmul.mubr.msk.bf16.vlgmr.msra.gmra.mxu1 %vm778_vm4, %v2663_v43 }
 0xb4f   :  { %3407 = vmatprep.mubr.msk.bf16.mxu1 %vm3948_vm5, %v3947_v26  ;;  %3404 = vmatpush3.bf16.msra.mxu1 %v3627_v57 }
 0xb50   :  { %3405 = vmatprep.subr.bf16.mxu1 %v3947_v26 }
 0xb53   :  { %3406 = vmatpush3.bf16.msra.mxu1 %v3628_v63 }
 0xc0e   :  { %v2725_v13 = vpop.f32.mrf.mxu1 }
 0xc0f   :  { %v2726_v59 = vadd.f32 %v2725_v13, %v2657_v47 }
 0xc10   :  { %v3381_v60 = vpop.f32.mrf.mxu1 }
 0xc11   :  { %v2738_v61 = vadd.f32 %v3136_v58, %v2726_v59 }
 0xc12   :  { %v2728_v62 = vpop.f32.mrf.mxu1 }
 0xc13   :  { %v2739_v1 = vpack.c.bf16 %v2738_v61, %v2738_v61 }
 0xc14   :  { %v3382_v50 = vpop.f32.mrf.mxu1 }
 0xc15   :  { %3400 = vmatmul.mubr.bf16.vlgmr.msra.gmra.mxu0 %v2739_v1 }
 0xcd5   :  { %v2845_v2 = vpop.f32.mrf.mxu0 }
 0xcd6   :  { %v2846_v52 = vadd.f32 %v3137_v51, %v2845_v2 }
 0xcd7   :  { %v3401_v3 = vpop.f32.mrf.mxu0 }
 0xcd8   :  { %v2851_v53 = vmax.f32 %v2846_v52, 0.0 }
 0xcd9   :  { %v2848_v26 = vpop.f32.mrf.mxu0 }
 0xcda   :  { %v2852_v54 = vpack.c.bf16 %v2851_v53, %v2851_v53 }
 0xcdb   :  { %v3402_v4 = vpop.f32.mrf.mxu0 }
 0xcdc   :  { %3408 = vmatmul.mubr.msk.bf16.vlgmr.msra.gmra.mxu1 %vm2876_vm6, %v2852_v54 }
 0xd9c   :  { %v2914_v7 = vpop.f32.mrf.mxu1 }
 0xd9d   :  { %v2915_v8 = vadd.f32 %v3146_v5, %v2914_v7 }
 0xd9e   :  { %v3409_v9 = vpop.f32.mrf.mxu1 }
 0xd9f   :  { %2921 = vst.msk [vmem:[#allocation17] sm:$0x3] %vm2920_vm7, %v2915_v8 }
 0xda0   :  { %v2917_v11 = vpop.f32.mrf.mxu1 }
 0xda1   :  { %3916 = shalt.err (!%p3913_p7)
}
 0xda2   :  { %2933 = dma.vmem_to_hbm [thread:$0]  %s2931_s28, 32, %s4969_s22, [#allocation4]   ;;  %v3410_v12 = vpop.f32.mrf.mxu1 }
 0xda3   :  { %3935 = dma.done.wait [#allocation4], 32  }
 0xda4   :  { %3936 = vsyncadd [#allocation4], 4294967264 }
 0xda5   :  { %2939 = vsyncpa [#allocation3], 1 }
 0xda6   :  { %2940 = vsyncpa [#allocation6], 1 }
 0xda7   :  { %2941 = vsyncpa [#allocation9], 1 }
 0xda8   :  { %2942 = vsyncpa [#allocation12], 1 }
 0xda9   :  { %2943 = vsyncpa [#allocation15], 1 }
 0xdaa   :  { %2944 = vsyncpa [#allocation4], 1 }

</bundles_post_ra>
